<compile_context>
chip_gen: v7x
topology: tpu7x:2x2x1
jax: 0.10.0
libtpu: 0.0.40
codegen_flags: <defaults>
</compile_context>

<pallas_src>
import functools

import jax
import jax.numpy as jnp
from jax.experimental import pallas as pl
from jax.experimental.pallas import tpu as pltpu


# -----------------------------------------------------------------------------
# Fused Pallas kernel: all LSTM layers + final FC, one batch block per program
# -----------------------------------------------------------------------------
def _lstm_model_kernel(x_ref, wih0_ref, wihr_ref, whh_ref, b_ref,
                       fcw_ref, fcb_ref, out_ref, xproj_ref, seq_ref,
                       *, num_layers, hidden, b_blk, seq_len, t_chunk):
    """Fused multi-layer LSTM + final FC for one batch block.

    x_ref    : (T*Bb, I)          seq-major input slab for this batch block
    wih0_ref : (I, 4H)            layer-0 input->hidden weight (pre-transposed)
    wihr_ref : (max(L-1,1),H,4H)  layers>=1 input->hidden weights (dummy if L==1)
    whh_ref  : (L, H, 4H)         hidden->hidden weights (pre-transposed)
    b_ref    : (L, 1, 4H) f32     combined bias b_ih + b_hh (gate-reordered)
    fcw_ref  : (H, Opad)          final linear weight (pre-transposed, padded)
    fcb_ref  : (1, Opad) f32      final linear bias
    out_ref  : (Bb, Opad) f32     output logits
    xproj_ref: (2*Tc*Bb, 4H) f32  ping-pong input-projection scratch
    seq_ref  : (T*Bb, H)          inter-layer hidden sequence (compute dtype)
    """
    H, Bb, T, Tc = hidden, b_blk, seq_len, t_chunk
    n_chunks = T // Tc
    chunk_rows = Tc * Bb
    aligned = (H % 128 == 0)
    cdtype = whh_ref.dtype

    if not aligned:
        # Hoisted lane mask; gate-reordered columns are [ i | f | o | g ].
        lane = jax.lax.broadcasted_iota(jnp.int32, (Bb, 4 * H), 1)
        is_g_lane = lane >= 3 * H

    def project_chunk(layer, chunk_idx, dst_row0):
        """xproj[dst:dst+chunk_rows] = input_chunk @ W_ih + b (one MXU matmul)."""
        src = pl.multiple_of(chunk_idx * chunk_rows, Bb)
        if layer == 0:
            xin = x_ref[pl.ds(src, chunk_rows), :]          # (Tc*Bb, I)
            w = wih0_ref[...]                                # (I, 4H)
        else:
            xin = seq_ref[pl.ds(src, chunk_rows), :]         # (Tc*Bb, H)
            w = wihr_ref[layer - 1]                          # (H, 4H)
        proj = jnp.dot(xin, w, preferred_element_type=jnp.float32) + b_ref[layer]
        dst = pl.multiple_of(dst_row0, Bb)
        xproj_ref[pl.ds(dst, chunk_rows), :] = proj

    h_last = jnp.zeros((Bb, H), jnp.float32)

    for layer in range(num_layers):                  # static unroll over layers
        whh = whh_ref[layer]                         # (H, 4H), loop-invariant
        last_layer = layer == num_layers - 1

        # Prologue: projection of chunk 0 into ping-pong slot 0.
        project_chunk(layer, 0, 0)

        def chunk_body(c, carry, _whh=whh, _layer=layer, _last=last_layer):
            slot = jax.lax.rem(c, 2)
            slot_base = slot * chunk_rows

            # Issue chunk c+1's projection into the other slot.  Independent
            # of the recurrence below -> the scheduler can overlap the big
            # MXU matmul with the serial per-step work.
            if n_chunks > 1:
                @pl.when(c + 1 < n_chunks)
                def _():
                    project_chunk(_layer, c + 1, (1 - slot) * chunk_rows)

            def step(t, hc):
                h_prev, c_prev = hc
                xrow = pl.multiple_of(slot_base + t * Bb, Bb)
                gates = (xproj_ref[pl.ds(xrow, Bb), :]
                         + jnp.dot(h_prev.astype(cdtype), _whh,
                                   preferred_element_type=jnp.float32))
                if aligned:
                    sig = jax.nn.sigmoid(gates[:, :3 * H])
                    i_g, f_g, o_g = sig[:, :H], sig[:, H:2 * H], sig[:, 2 * H:]
                    g_g = jnp.tanh(gates[:, 3 * H:])
                else:
                    act = jnp.where(is_g_lane, jnp.tanh(gates),
                                    jax.nn.sigmoid(gates))
                    i_g, f_g = act[:, :H], act[:, H:2 * H]
                    o_g, g_g = act[:, 2 * H:3 * H], act[:, 3 * H:]
                c_new = f_g * c_prev + i_g * g_g
                h_new = o_g * jnp.tanh(c_new)
                if not _last:                        # last layer: only h[T-1] needed
                    srow = pl.multiple_of((c * Tc + t) * Bb, Bb)
                    seq_ref[pl.ds(srow, Bb), :] = h_new.astype(seq_ref.dtype)
                return h_new, c_new

            return jax.lax.fori_loop(0, Tc, step, carry, unroll=min(4, Tc))

        h0 = jnp.zeros((Bb, H), jnp.float32)
        c0 = jnp.zeros((Bb, H), jnp.float32)
        h_last, _ = jax.lax.fori_loop(0, n_chunks, chunk_body, (h0, c0))

    # Final FC on the last time step of the last layer (lane-dense Opad store).
    out_ref[...] = (jnp.dot(h_last.astype(cdtype), fcw_ref[...],
                            preferred_element_type=jnp.float32)
                    + fcb_ref[...]).astype(out_ref.dtype)


# -----------------------------------------------------------------------------
# Wrapper
# -----------------------------------------------------------------------------
def _reorder_gates(w):
    """PyTorch gate order (i, f, g, o) -> (i, f, o, g) along the leading 4H axis."""
    H = w.shape[0] // 4
    return jnp.concatenate([w[:2 * H], w[3 * H:], w[2 * H:3 * H]], axis=0)


def lstm_model_forward(x_bti, lstm_params, fc_w, fc_b, *,
                       compute_dtype=jnp.bfloat16, time_chunk=None):
    """Matches LSTMModel.forward: out, _ = lstm(x); return fc(out[:, -1, :])."""
    B, T, I = x_bti.shape
    num_layers = len(lstm_params)
    H = lstm_params[0][1].shape[1]
    O = fc_w.shape[0]
    cd = compute_dtype

    # --- batch blocking: one grid step per batch block ("parallel" axis). ----
    if B <= 128:
        B_blk = max(8, -(-B // 8) * 8)               # pad to sublane multiple
        B_pad = B_blk
    else:
        B_blk = 128
        B_pad = -(-B // 128) * 128
    n_bblk = B_pad // B_blk

    # --- time chunk (divisor of T), sized against a small VMEM budget. -------
    def _largest_divisor_leq(n, k):
        k = max(1, min(n, k))
        for d in range(k, 0, -1):
            if n % d == 0:
                return d
        return 1

    if time_chunk is None:
        # keep the 2-slot f32 projection ping-pong around ~2 MiB
        budget_rows = max(1, (2 * 1024 * 1024) // (2 * 4 * (4 * H) * B_blk))
        time_chunk = min(64, budget_rows)
    Tc = _largest_divisor_leq(T, time_chunk)

    O_pad = -(-O // 128) * 128                       # lane-dense output store

    # --- input layout: (B, T, I) -> (n_bblk, T*B_blk, I), seq-major rows. ----
    x = jnp.pad(x_bti, ((0, B_pad - B), (0, 0), (0, 0)))          # (B_pad, T, I)
    x = x.reshape(n_bblk, B_blk, T, I).transpose(0, 2, 1, 3)      # (nb, T, Bb, I)
    x = x.reshape(n_bblk, T * B_blk, I).astype(cd)

    # --- pre-transposed, gate-reordered weights (layout plumbing). -----------
    wih0_T = _reorder_gates(lstm_params[0][0]).T.astype(cd)       # (I, 4H)
    if num_layers > 1:
        wihr_T = jnp.stack([_reorder_gates(p[0]).T
                            for p in lstm_params[1:]]).astype(cd)  # (L-1, H, 4H)
    else:
        wihr_T = jnp.zeros((1, H, 4 * H), cd)                      # dummy, unused
    whh_T = jnp.stack([_reorder_gates(p[1]).T
                       for p in lstm_params]).astype(cd)           # (L, H, 4H)
    bias = jnp.stack([_reorder_gates(p[2] + p[3]).reshape(1, 4 * H)
                      for p in lstm_params]).astype(jnp.float32)   # (L, 1, 4H)
    fcw_T = jnp.pad(fc_w, ((0, O_pad - O), (0, 0))).T.astype(cd)   # (H, O_pad)
    fcb2 = jnp.pad(fc_b, (0, O_pad - O)).reshape(1, O_pad).astype(jnp.float32)

    kernel = functools.partial(
        _lstm_model_kernel, num_layers=num_layers, hidden=H,
        b_blk=B_blk, seq_len=T, t_chunk=Tc)

    seq_rows = T * B_blk if num_layers > 1 else 8    # tiny dummy if single layer

    grid_spec = pltpu.PrefetchScalarGridSpec(
        num_scalar_prefetch=0,
        grid=(n_bblk,),
        in_specs=[
            pl.BlockSpec((None, T * B_blk, I), lambda b: (b, 0, 0)),
            pl.BlockSpec((I, 4 * H), lambda b: (0, 0)),
            pl.BlockSpec(wihr_T.shape, lambda b: (0, 0, 0)),
            pl.BlockSpec(whh_T.shape, lambda b: (0, 0, 0)),
            pl.BlockSpec(bias.shape, lambda b: (0, 0, 0)),
            pl.BlockSpec((H, O_pad), lambda b: (0, 0)),
            pl.BlockSpec((1, O_pad), lambda b: (0, 0)),
        ],
        out_specs=pl.BlockSpec((B_blk, O_pad), lambda b: (b, 0)),
        scratch_shapes=[
            pltpu.VMEM((2 * Tc * B_blk, 4 * H), jnp.float32),  # proj ping-pong
            pltpu.VMEM((seq_rows, H), cd),                     # inter-layer seq
        ],
    )

    out = pl.pallas_call(
        kernel,
        out_shape=jax.ShapeDtypeStruct((B_pad, O_pad), jnp.float32),
        grid_spec=grid_spec,
        compiler_params=pltpu.CompilerParams(
            dimension_semantics=("parallel",),
            vmem_limit_bytes=64 * 1024 * 1024,
        ),
    )(x, wih0_T, wihr_T, whh_T, bias, fcw_T, fcb2)

    return out[:B, :O]


# -----------------------------------------------------------------------------
# Pure-JAX reference (for correctness check)
# -----------------------------------------------------------------------------
def lstm_model_ref(x_bti, lstm_params, fc_w, fc_b):
    hp = jax.lax.Precision.HIGHEST
    h_seq = x_bti
    for (w_ih, w_hh, b_ih, b_hh) in lstm_params:
        B, T, _ = h_seq.shape
        H = w_hh.shape[1]

        def step(carry, x_t):
            h, c = carry
            g = (jnp.dot(x_t, w_ih.T, precision=hp) + b_ih
                 + jnp.dot(h, w_hh.T, precision=hp) + b_hh)
            i = jax.nn.sigmoid(g[:, 0 * H:1 * H])
            f = jax.nn.sigmoid(g[:, 1 * H:2 * H])
            gg = jnp.tanh(g[:, 2 * H:3 * H])
            o = jax.nn.sigmoid(g[:, 3 * H:4 * H])
            c = f * c + i * gg
            h = o * jnp.tanh(c)
            return (h, c), h

        init = (jnp.zeros((B, H), jnp.float32), jnp.zeros((B, H), jnp.float32))
        _, hs = jax.lax.scan(step, init, jnp.transpose(h_seq, (1, 0, 2)))
        h_seq = jnp.transpose(hs, (1, 0, 2))
    return jnp.dot(h_seq[:, -1, :], fc_w.T, precision=hp) + fc_b


# -----------------------------------------------------------------------------
# Parameter init (deterministic, PyTorch-style uniform(-1/sqrt(H), 1/sqrt(H)))
# -----------------------------------------------------------------------------
def init_params(key, input_size, hidden_size, num_layers, output_size):
    bound = 1.0 / jnp.sqrt(hidden_size)
    lstm_params = []
    for layer in range(num_layers):
        in_sz = input_size if layer == 0 else hidden_size
        key, k1, k2, k3, k4 = jax.random.split(key, 5)
        w_ih = jax.random.uniform(k1, (4 * hidden_size, in_sz),
                                  jnp.float32, -bound, bound)
        w_hh = jax.random.uniform(k2, (4 * hidden_size, hidden_size),
                                  jnp.float32, -bound, bound)
        b_ih = jax.random.uniform(k3, (4 * hidden_size,),
                                  jnp.float32, -bound, bound)
        b_hh = jax.random.uniform(k4, (4 * hidden_size,),
                                  jnp.float32, -bound, bound)
        lstm_params.append((w_ih, w_hh, b_ih, b_hh))
    key, k5, k6 = jax.random.split(key, 3)
    fc_w = jax.random.uniform(k5, (output_size, hidden_size),
                              jnp.float32, -bound, bound)
    fc_b = jax.random.uniform(k6, (output_size,), jnp.float32, -bound, bound)
    return lstm_params, fc_w, fc_b


# -----------------------------------------------------------------------------
if __name__ == "__main__":
    BATCH = 2
    SEQ = 8
    INPUT_SIZE = 16
    HIDDEN_SIZE = 32
    NUM_LAYERS = 2
    OUTPUT_SIZE = 4

    key = jax.random.PRNGKey(0)
    key, kx = jax.random.split(key)
    x = jax.random.normal(kx, (BATCH, SEQ, INPUT_SIZE), jnp.float32)

    lstm_params, fc_w, fc_b = init_params(
        key, INPUT_SIZE, HIDDEN_SIZE, NUM_LAYERS, OUTPUT_SIZE)

    ref = jax.block_until_ready(lstm_model_ref(x, lstm_params, fc_w, fc_b))

    # f32 compute path (tight parity with the reference); time_chunk=4 so the
    # chunked / ping-pong projection path is exercised (2 chunks of T=8).
    out_f32 = jax.block_until_ready(
        lstm_model_forward(x, lstm_params, fc_w, fc_b,
                           compute_dtype=jnp.float32, time_chunk=4))
    assert out_f32.shape == (BATCH, OUTPUT_SIZE), out_f32.shape
    d32 = float(jnp.max(jnp.abs(out_f32 - ref)))
    assert d32 < 2e-3, f"f32 mismatch: max abs diff {d32}"

    # bf16-weight path (default; ~2x MXU throughput) with loosened tolerance.
    out_bf16 = jax.block_until_ready(
        lstm_model_forward(x, lstm_params, fc_w, fc_b,
                           compute_dtype=jnp.bfloat16, time_chunk=4))
    assert out_bf16.shape == (BATCH, OUTPUT_SIZE), out_bf16.shape
    d16 = float(jnp.max(jnp.abs(out_bf16 - ref)))
    assert d16 < 5e-2, f"bf16 mismatch: max abs diff {d16}"

    print("KERNEL_OK")
</pallas_src>

<mosaic_0001>
module attributes {stable_mosaic.version = 11 : i64} {
  func.func @_lstm_model_kernel(%arg0: i32, %arg1: memref<1x64x16xf32, #tpu.memory_space<vmem>>, %arg2: memref<16x128xf32, #tpu.memory_space<vmem>>, %arg3: memref<1x32x128xf32, #tpu.memory_space<vmem>>, %arg4: memref<2x32x128xf32, #tpu.memory_space<vmem>>, %arg5: memref<2x1x128xf32, #tpu.memory_space<vmem>>, %arg6: memref<32x128xf32, #tpu.memory_space<vmem>>, %arg7: memref<1x128xf32, #tpu.memory_space<vmem>>, %arg8: memref<8x128xf32, #tpu.memory_space<vmem>>, %arg9: memref<64x128xf32, #tpu.memory_space<vmem>>, %arg10: memref<64x32xf32, #tpu.memory_space<vmem>>) attributes {dimension_semantics = [#tpu.dimension_semantics<parallel>], iteration_bounds = array<i64: 1>, scalar_prefetch = 0 : i64, scratch_operands = 2 : i64, tpu.core_type = #tpu.core_type<tc>, window_params = [{transform_indices = @transform_0, window_bounds = array<i64: 1, 64, 16>}, {pipeline_mode = #tpu.pipeline_mode<synchronous>, transform_indices = @transform_1, window_bounds = array<i64: 16, 128>}, {pipeline_mode = #tpu.pipeline_mode<synchronous>, transform_indices = @transform_2, window_bounds = array<i64: 1, 32, 128>}, {pipeline_mode = #tpu.pipeline_mode<synchronous>, transform_indices = @transform_3, window_bounds = array<i64: 2, 32, 128>}, {pipeline_mode = #tpu.pipeline_mode<synchronous>, transform_indices = @transform_4, window_bounds = array<i64: 2, 1, 128>}, {pipeline_mode = #tpu.pipeline_mode<synchronous>, transform_indices = @transform_5, window_bounds = array<i64: 32, 128>}, {pipeline_mode = #tpu.pipeline_mode<synchronous>, transform_indices = @transform_6, window_bounds = array<i64: 1, 128>}, {transform_indices = @transform_7, window_bounds = array<i64: 8, 128>}]} {
    %0 = tpu.iota {dimensions = array<i32: 1>} : vector<8x128xi32>
    %c96_i32 = arith.constant 96 : i32
    %1 = vector.broadcast %c96_i32 : i32 to vector<8x128xi32>
    %2 = arith.cmpi sge, %0, %1 : vector<8x128xi32>
    %c0 = arith.constant 0 : index
    %c0_0 = arith.constant 0 : index
    %c0_1 = arith.constant 0 : index
    %3 = vector.load %arg4[%c0, %c0_0, %c0_1] : memref<2x32x128xf32, #tpu.memory_space<vmem>>, vector<1x32x128xf32>
    %4 = vector.shape_cast %3 : vector<1x32x128xf32> to vector<32x128xf32>
    %c0_i32 = arith.constant 0 : i32
    %5 = tpu.assume_multiple %c0_i32, 8 : i32
    %c0_2 = arith.constant 0 : index
    %6 = arith.index_cast %5 : i32 to index
    %c0_3 = arith.constant 0 : index
    %7 = vector.load %arg1[%c0_2, %6, %c0_3] : memref<1x64x16xf32, #tpu.memory_space<vmem>>, vector<1x32x16xf32>
    %8 = vector.shape_cast %7 : vector<1x32x16xf32> to vector<32x16xf32>
    %c0_4 = arith.constant 0 : index
    %c0_5 = arith.constant 0 : index
    %9 = vector.load %arg2[%c0_4, %c0_5] : memref<16x128xf32, #tpu.memory_space<vmem>>, vector<16x128xf32>
    %cst = arith.constant dense<0.000000e+00> : vector<32x128xf32>
    %10 = tpu.matmul %8, %9, %cst {dimension_numbers = #tpu.dot_dimension_numbers<[1], [0], [0], [1], [0, 0, 1, 1], [], []>} : vector<32x16xf32>, vector<16x128xf32>, vector<32x128xf32> -> vector<32x128xf32>
    %c0_6 = arith.constant 0 : index
    %c0_7 = arith.constant 0 : index
    %c0_8 = arith.constant 0 : index
    %11 = vector.load %arg5[%c0_6, %c0_7, %c0_8] : memref<2x1x128xf32, #tpu.memory_space<vmem>>, vector<1x1x128xf32>
    %12 = vector.shape_cast %11 : vector<1x1x128xf32> to vector<1x128xf32>
    %13 = vector.broadcast %12 : vector<1x128xf32> to vector<32x128xf32>
    %14 = arith.addf %10, %13 : vector<32x128xf32>
    %c0_i32_9 = arith.constant 0 : i32
    %15 = tpu.assume_multiple %c0_i32_9, 8 : i32
    %16 = arith.index_cast %15 : i32 to index
    %c0_10 = arith.constant 0 : index
    %17 = vector.load %arg9[%16, %c0_10] : memref<64x128xf32, #tpu.memory_space<vmem>>, vector<32x128xf32>
    tpu.vector_store %arg9[%16, %c0_10], %14 {strides = array<i32>} : memref<64x128xf32, #tpu.memory_space<vmem>>, vector<32x128xf32>,
    %cst_11 = arith.constant 0.000000e+00 : f32
    %18 = vector.broadcast %cst_11 : f32 to vector<8x32xf32>
    %cst_12 = arith.constant 0.000000e+00 : f32
    %19 = vector.broadcast %cst_12 : f32 to vector<8x32xf32>
    %c0_i32_13 = arith.constant 0 : i32
    %c2_i32 = arith.constant 2 : i32
    %20 = arith.addi %c0_i32_13, %c2_i32 : i32
    %c1_i32 = arith.constant 1 : i32
    %21:2 = scf.for %arg11 = %c0_i32_13 to %20 step %c1_i32 iter_args(%arg12 = %18, %arg13 = %19) -> (vector<8x32xf32>, vector<8x32xf32>)  : i32 {
      %c2_i32_41 = arith.constant 2 : i32
      %47 = arith.remsi %arg11, %c2_i32_41 : i32
      %c32_i32 = arith.constant 32 : i32
      %48 = arith.muli %47, %c32_i32 : i32
      %c1_i32_42 = arith.constant 1 : i32
      %49 = arith.addi %arg11, %c1_i32_42 : i32
      %c2_i32_43 = arith.constant 2 : i32
      %50 = arith.cmpi slt, %49, %c2_i32_43 : i32
      %51 = arith.extui %50 : i1 to i32
      %c0_i32_44 = arith.constant 0 : i32
      %52 = arith.cmpi ne, %51, %c0_i32_44 : i32
      scf.if %52 {
        %c1_i32_75 = arith.constant 1 : i32
        %169 = arith.addi %arg11, %c1_i32_75 : i32
        %c1_i32_76 = arith.constant 1 : i32
        %170 = arith.subi %c1_i32_76, %47 : i32
        %c32_i32_77 = arith.constant 32 : i32
        %171 = arith.muli %170, %c32_i32_77 : i32
        %c32_i32_78 = arith.constant 32 : i32
        %172 = arith.muli %169, %c32_i32_78 : i32
        %173 = tpu.assume_multiple %172, 8 : i32
        %c0_79 = arith.constant 0 : index
        %174 = arith.index_cast %173 : i32 to index
        %c0_80 = arith.constant 0 : index
        %175 = vector.load %arg1[%c0_79, %174, %c0_80] : memref<1x64x16xf32, #tpu.memory_space<vmem>>, vector<1x32x16xf32>
        %176 = vector.shape_cast %175 : vector<1x32x16xf32> to vector<32x16xf32>
        %c0_81 = arith.constant 0 : index
        %c0_82 = arith.constant 0 : index
        %177 = vector.load %arg2[%c0_81, %c0_82] : memref<16x128xf32, #tpu.memory_space<vmem>>, vector<16x128xf32>
        %cst_83 = arith.constant dense<0.000000e+00> : vector<32x128xf32>
        %178 = tpu.matmul %176, %177, %cst_83 {dimension_numbers = #tpu.dot_dimension_numbers<[1], [0], [0], [1], [0, 0, 1, 1], [], []>} : vector<32x16xf32>, vector<16x128xf32>, vector<32x128xf32> -> vector<32x128xf32>
        %c0_84 = arith.constant 0 : index
        %c0_85 = arith.constant 0 : index
        %c0_86 = arith.constant 0 : index
        %179 = vector.load %arg5[%c0_84, %c0_85, %c0_86] : memref<2x1x128xf32, #tpu.memory_space<vmem>>, vector<1x1x128xf32>
        %180 = vector.shape_cast %179 : vector<1x1x128xf32> to vector<1x128xf32>
        %181 = vector.broadcast %180 : vector<1x128xf32> to vector<32x128xf32>
        %182 = arith.addf %178, %181 : vector<32x128xf32>
        %183 = tpu.assume_multiple %171, 8 : i32
        %184 = arith.index_cast %183 : i32 to index
        %c0_87 = arith.constant 0 : index
        %185 = vector.load %arg9[%184, %c0_87] : memref<64x128xf32, #tpu.memory_space<vmem>>, vector<32x128xf32>
        tpu.vector_store %arg9[%184, %c0_87], %182 {strides = array<i32>} : memref<64x128xf32, #tpu.memory_space<vmem>>, vector<32x128xf32>,
      } else {
      }
      %c0_i32_45 = arith.constant 0 : i32
      %c8_i32 = arith.constant 8 : i32
      %53 = arith.muli %c0_i32_45, %c8_i32 : i32
      %54 = arith.addi %48, %53 : i32
      %55 = tpu.assume_multiple %54, 8 : i32
      %56 = arith.index_cast %55 : i32 to index
      %c0_46 = arith.constant 0 : index
      %57 = vector.load %arg9[%56, %c0_46] : memref<64x128xf32, #tpu.memory_space<vmem>>, vector<8x128xf32>
      %cst_47 = arith.constant dense<0.000000e+00> : vector<8x128xf32>
      %58 = tpu.matmul %arg12, %4, %cst_47 {dimension_numbers = #tpu.dot_dimension_numbers<[1], [0], [0], [1], [0, 0, 1, 1], [], []>} : vector<8x32xf32>, vector<32x128xf32>, vector<8x128xf32> -> vector<8x128xf32>
      %59 = arith.addf %57, %58 : vector<8x128xf32>
      %60 = math.tanh %59 : vector<8x128xf32>
      %61 = arith.negf %59 : vector<8x128xf32>
      %62 = math.exp %61 : vector<8x128xf32>
      %cst_48 = arith.constant 1.000000e+00 : f32
      %63 = vector.broadcast %cst_48 : f32 to vector<8x128xf32>
      %64 = arith.addf %63, %62 : vector<8x128xf32>
      %65 = arith.divf %63, %64 : vector<8x128xf32>
      %66 = arith.select %2, %60, %65 : vector<8x128xi1>, vector<8x128xf32>
      %67 = vector.extract_strided_slice %66 {offsets = [0, 0], sizes = [8, 32], strides = [1, 1]} : vector<8x128xf32> to vector<8x32xf32>
      %68 = vector.extract_strided_slice %66 {offsets = [0, 32], sizes = [8, 32], strides = [1, 1]} : vector<8x128xf32> to vector<8x32xf32>
      %69 = vector.extract_strided_slice %66 {offsets = [0, 64], sizes = [8, 32], strides = [1, 1]} : vector<8x128xf32> to vector<8x32xf32>
      %70 = vector.extract_strided_slice %66 {offsets = [0, 96], sizes = [8, 32], strides = [1, 1]} : vector<8x128xf32> to vector<8x32xf32>
      %71 = arith.mulf %68, %arg13 : vector<8x32xf32>
      %72 = arith.mulf %67, %70 : vector<8x32xf32>
      %73 = arith.addf %71, %72 : vector<8x32xf32>
      %74 = math.tanh %73 : vector<8x32xf32>
      %75 = arith.mulf %69, %74 : vector<8x32xf32>
      %c4_i32 = arith.constant 4 : i32
      %76 = arith.muli %arg11, %c4_i32 : i32
      %77 = arith.addi %76, %c0_i32_45 : i32
      %c8_i32_49 = arith.constant 8 : i32
      %78 = arith.muli %77, %c8_i32_49 : i32
      %79 = tpu.assume_multiple %78, 8 : i32
      %80 = arith.index_cast %79 : i32 to index
      %c0_50 = arith.constant 0 : index
      %81 = vector.load %arg10[%80, %c0_50] : memref<64x32xf32, #tpu.memory_space<vmem>>, vector<8x32xf32>
      tpu.vector_store %arg10[%80, %c0_50], %75 {strides = array<i32>} : memref<64x32xf32, #tpu.memory_space<vmem>>, vector<8x32xf32>,
      %c1_i32_51 = arith.constant 1 : i32
      %c8_i32_52 = arith.constant 8 : i32
      %82 = arith.muli %c1_i32_51, %c8_i32_52 : i32
      %83 = arith.addi %48, %82 : i32
      %84 = tpu.assume_multiple %83, 8 : i32
      %85 = arith.index_cast %84 : i32 to index
      %c0_53 = arith.constant 0 : index
      %86 = vector.load %arg9[%85, %c0_53] : memref<64x128xf32, #tpu.memory_space<vmem>>, vector<8x128xf32>
      %cst_54 = arith.constant dense<0.000000e+00> : vector<8x128xf32>
      %87 = tpu.matmul %75, %4, %cst_54 {dimension_numbers = #tpu.dot_dimension_numbers<[1], [0], [0], [1], [0, 0, 1, 1], [], []>} : vector<8x32xf32>, vector<32x128xf32>, vector<8x128xf32> -> vector<8x128xf32>
      %88 = arith.addf %86, %87 : vector<8x128xf32>
      %89 = math.tanh %88 : vector<8x128xf32>
      %90 = arith.negf %88 : vector<8x128xf32>
      %91 = math.exp %90 : vector<8x128xf32>
      %cst_55 = arith.constant 1.000000e+00 : f32
      %92 = vector.broadcast %cst_55 : f32 to vector<8x128xf32>
      %93 = arith.addf %92, %91 : vector<8x128xf32>
      %94 = arith.divf %92, %93 : vector<8x128xf32>
      %95 = arith.select %2, %89, %94 : vector<8x128xi1>, vector<8x128xf32>
      %96 = vector.extract_strided_slice %95 {offsets = [0, 0], sizes = [8, 32], strides = [1, 1]} : vector<8x128xf32> to vector<8x32xf32>
      %97 = vector.extract_strided_slice %95 {offsets = [0, 32], sizes = [8, 32], strides = [1, 1]} : vector<8x128xf32> to vector<8x32xf32>
      %98 = vector.extract_strided_slice %95 {offsets = [0, 64], sizes = [8, 32], strides = [1, 1]} : vector<8x128xf32> to vector<8x32xf32>
      %99 = vector.extract_strided_slice %95 {offsets = [0, 96], sizes = [8, 32], strides = [1, 1]} : vector<8x128xf32> to vector<8x32xf32>
      %100 = arith.mulf %97, %73 : vector<8x32xf32>
      %101 = arith.mulf %96, %99 : vector<8x32xf32>
      %102 = arith.addf %100, %101 : vector<8x32xf32>
      %103 = math.tanh %102 : vector<8x32xf32>
      %104 = arith.mulf %98, %103 : vector<8x32xf32>
      %c4_i32_56 = arith.constant 4 : i32
      %105 = arith.muli %arg11, %c4_i32_56 : i32
      %106 = arith.addi %105, %c1_i32_51 : i32
      %c8_i32_57 = arith.constant 8 : i32
      %107 = arith.muli %106, %c8_i32_57 : i32
      %108 = tpu.assume_multiple %107, 8 : i32
      %109 = arith.index_cast %108 : i32 to index
      %c0_58 = arith.constant 0 : index
      %110 = vector.load %arg10[%109, %c0_58] : memref<64x32xf32, #tpu.memory_space<vmem>>, vector<8x32xf32>
      tpu.vector_store %arg10[%109, %c0_58], %104 {strides = array<i32>} : memref<64x32xf32, #tpu.memory_space<vmem>>, vector<8x32xf32>,
      %c2_i32_59 = arith.constant 2 : i32
      %c8_i32_60 = arith.constant 8 : i32
      %111 = arith.muli %c2_i32_59, %c8_i32_60 : i32
      %112 = arith.addi %48, %111 : i32
      %113 = tpu.assume_multiple %112, 8 : i32
      %114 = arith.index_cast %113 : i32 to index
      %c0_61 = arith.constant 0 : index
      %115 = vector.load %arg9[%114, %c0_61] : memref<64x128xf32, #tpu.memory_space<vmem>>, vector<8x128xf32>
      %cst_62 = arith.constant dense<0.000000e+00> : vector<8x128xf32>
      %116 = tpu.matmul %104, %4, %cst_62 {dimension_numbers = #tpu.dot_dimension_numbers<[1], [0], [0], [1], [0, 0, 1, 1], [], []>} : vector<8x32xf32>, vector<32x128xf32>, vector<8x128xf32> -> vector<8x128xf32>
      %117 = arith.addf %115, %116 : vector<8x128xf32>
      %118 = math.tanh %117 : vector<8x128xf32>
      %119 = arith.negf %117 : vector<8x128xf32>
      %120 = math.exp %119 : vector<8x128xf32>
      %cst_63 = arith.constant 1.000000e+00 : f32
      %121 = vector.broadcast %cst_63 : f32 to vector<8x128xf32>
      %122 = arith.addf %121, %120 : vector<8x128xf32>
      %123 = arith.divf %121, %122 : vector<8x128xf32>
      %124 = arith.select %2, %118, %123 : vector<8x128xi1>, vector<8x128xf32>
      %125 = vector.extract_strided_slice %124 {offsets = [0, 0], sizes = [8, 32], strides = [1, 1]} : vector<8x128xf32> to vector<8x32xf32>
      %126 = vector.extract_strided_slice %124 {offsets = [0, 32], sizes = [8, 32], strides = [1, 1]} : vector<8x128xf32> to vector<8x32xf32>
      %127 = vector.extract_strided_slice %124 {offsets = [0, 64], sizes = [8, 32], strides = [1, 1]} : vector<8x128xf32> to vector<8x32xf32>
      %128 = vector.extract_strided_slice %124 {offsets = [0, 96], sizes = [8, 32], strides = [1, 1]} : vector<8x128xf32> to vector<8x32xf32>
      %129 = arith.mulf %126, %102 : vector<8x32xf32>
      %130 = arith.mulf %125, %128 : vector<8x32xf32>
      %131 = arith.addf %129, %130 : vector<8x32xf32>
      %132 = math.tanh %131 : vector<8x32xf32>
      %133 = arith.mulf %127, %132 : vector<8x32xf32>
      %c4_i32_64 = arith.constant 4 : i32
      %134 = arith.muli %arg11, %c4_i32_64 : i32
      %135 = arith.addi %134, %c2_i32_59 : i32
      %c8_i32_65 = arith.constant 8 : i32
      %136 = arith.muli %135, %c8_i32_65 : i32
      %137 = tpu.assume_multiple %136, 8 : i32
      %138 = arith.index_cast %137 : i32 to index
      %c0_66 = arith.constant 0 : index
      %139 = vector.load %arg10[%138, %c0_66] : memref<64x32xf32, #tpu.memory_space<vmem>>, vector<8x32xf32>
      tpu.vector_store %arg10[%138, %c0_66], %133 {strides = array<i32>} : memref<64x32xf32, #tpu.memory_space<vmem>>, vector<8x32xf32>,
      %c3_i32 = arith.constant 3 : i32
      %c8_i32_67 = arith.constant 8 : i32
      %140 = arith.muli %c3_i32, %c8_i32_67 : i32
      %141 = arith.addi %48, %140 : i32
      %142 = tpu.assume_multiple %141, 8 : i32
      %143 = arith.index_cast %142 : i32 to index
      %c0_68 = arith.constant 0 : index
      %144 = vector.load %arg9[%143, %c0_68] : memref<64x128xf32, #tpu.memory_space<vmem>>, vector<8x128xf32>
      %cst_69 = arith.constant dense<0.000000e+00> : vector<8x128xf32>
      %145 = tpu.matmul %133, %4, %cst_69 {dimension_numbers = #tpu.dot_dimension_numbers<[1], [0], [0], [1], [0, 0, 1, 1], [], []>} : vector<8x32xf32>, vector<32x128xf32>, vector<8x128xf32> -> vector<8x128xf32>
      %146 = arith.addf %144, %145 : vector<8x128xf32>
      %147 = math.tanh %146 : vector<8x128xf32>
      %148 = arith.negf %146 : vector<8x128xf32>
      %149 = math.exp %148 : vector<8x128xf32>
      %cst_70 = arith.constant 1.000000e+00 : f32
      %150 = vector.broadcast %cst_70 : f32 to vector<8x128xf32>
      %151 = arith.addf %150, %149 : vector<8x128xf32>
      %152 = arith.divf %150, %151 : vector<8x128xf32>
      %153 = arith.select %2, %147, %152 : vector<8x128xi1>, vector<8x128xf32>
      %154 = vector.extract_strided_slice %153 {offsets = [0, 0], sizes = [8, 32], strides = [1, 1]} : vector<8x128xf32> to vector<8x32xf32>
      %155 = vector.extract_strided_slice %153 {offsets = [0, 32], sizes = [8, 32], strides = [1, 1]} : vector<8x128xf32> to vector<8x32xf32>
      %156 = vector.extract_strided_slice %153 {offsets = [0, 64], sizes = [8, 32], strides = [1, 1]} : vector<8x128xf32> to vector<8x32xf32>
      %157 = vector.extract_strided_slice %153 {offsets = [0, 96], sizes = [8, 32], strides = [1, 1]} : vector<8x128xf32> to vector<8x32xf32>
      %158 = arith.mulf %155, %131 : vector<8x32xf32>
      %159 = arith.mulf %154, %157 : vector<8x32xf32>
      %160 = arith.addf %158, %159 : vector<8x32xf32>
      %161 = math.tanh %160 : vector<8x32xf32>
      %162 = arith.mulf %156, %161 : vector<8x32xf32>
      %c4_i32_71 = arith.constant 4 : i32
      %163 = arith.muli %arg11, %c4_i32_71 : i32
      %164 = arith.addi %163, %c3_i32 : i32
      %c8_i32_72 = arith.constant 8 : i32
      %165 = arith.muli %164, %c8_i32_72 : i32
      %166 = tpu.assume_multiple %165, 8 : i32
      %167 = arith.index_cast %166 : i32 to index
      %c0_73 = arith.constant 0 : index
      %168 = vector.load %arg10[%167, %c0_73] : memref<64x32xf32, #tpu.memory_space<vmem>>, vector<8x32xf32>
      tpu.vector_store %arg10[%167, %c0_73], %162 {strides = array<i32>} : memref<64x32xf32, #tpu.memory_space<vmem>>, vector<8x32xf32>,
      %c4_i32_74 = arith.constant 4 : i32
      scf.yield %162, %160 : vector<8x32xf32>, vector<8x32xf32>
    }
    %c2_i32_14 = arith.constant 2 : i32
    %c1 = arith.constant 1 : index
    %c0_15 = arith.constant 0 : index
    %c0_16 = arith.constant 0 : index
    %22 = vector.load %arg4[%c1, %c0_15, %c0_16] : memref<2x32x128xf32, #tpu.memory_space<vmem>>, vector<1x32x128xf32>
    %23 = vector.shape_cast %22 : vector<1x32x128xf32> to vector<32x128xf32>
    %c0_i32_17 = arith.constant 0 : i32
    %24 = tpu.assume_multiple %c0_i32_17, 8 : i32
    %25 = arith.index_cast %24 : i32 to index
    %c0_18 = arith.constant 0 : index
    %26 = vector.load %arg10[%25, %c0_18] : memref<64x32xf32, #tpu.memory_space<vmem>>, vector<32x32xf32>
    %c0_19 = arith.constant 0 : index
    %c0_20 = arith.constant 0 : index
    %c0_21 = arith.constant 0 : index
    %27 = vector.load %arg3[%c0_19, %c0_20, %c0_21] : memref<1x32x128xf32, #tpu.memory_space<vmem>>, vector<1x32x128xf32>
    %28 = vector.shape_cast %27 : vector<1x32x128xf32> to vector<32x128xf32>
    %cst_22 = arith.constant dense<0.000000e+00> : vector<32x128xf32>
    %29 = tpu.matmul %26, %28, %cst_22 {dimension_numbers = #tpu.dot_dimension_numbers<[1], [0], [0], [1], [0, 0, 1, 1], [], []>} : vector<32x32xf32>, vector<32x128xf32>, vector<32x128xf32> -> vector<32x128xf32>
    %c1_23 = arith.constant 1 : index
    %c0_24 = arith.constant 0 : index
    %c0_25 = arith.constant 0 : index
    %30 = vector.load %arg5[%c1_23, %c0_24, %c0_25] : memref<2x1x128xf32, #tpu.memory_space<vmem>>, vector<1x1x128xf32>
    %31 = vector.shape_cast %30 : vector<1x1x128xf32> to vector<1x128xf32>
    %32 = vector.broadcast %31 : vector<1x128xf32> to vector<32x128xf32>
    %33 = arith.addf %29, %32 : vector<32x128xf32>
    %c0_i32_26 = arith.constant 0 : i32
    %34 = tpu.assume_multiple %c0_i32_26, 8 : i32
    %35 = arith.index_cast %34 : i32 to index
    %c0_27 = arith.constant 0 : index
    %36 = vector.load %arg9[%35, %c0_27] : memref<64x128xf32, #tpu.memory_space<vmem>>, vector<32x128xf32>
    tpu.vector_store %arg9[%35, %c0_27], %33 {strides = array<i32>} : memref<64x128xf32, #tpu.memory_space<vmem>>, vector<32x128xf32>,
    %cst_28 = arith.constant 0.000000e+00 : f32
    %37 = vector.broadcast %cst_28 : f32 to vector<8x32xf32>
    %cst_29 = arith.constant 0.000000e+00 : f32
    %38 = vector.broadcast %cst_29 : f32 to vector<8x32xf32>
    %c0_i32_30 = arith.constant 0 : i32
    %c2_i32_31 = arith.constant 2 : i32
    %39 = arith.addi %c0_i32_30, %c2_i32_31 : i32
    %c1_i32_32 = arith.constant 1 : i32
    %40:2 = scf.for %arg11 = %c0_i32_30 to %39 step %c1_i32_32 iter_args(%arg12 = %37, %arg13 = %38) -> (vector<8x32xf32>, vector<8x32xf32>)  : i32 {
      %c2_i32_41 = arith.constant 2 : i32
      %47 = arith.remsi %arg11, %c2_i32_41 : i32
      %c32_i32 = arith.constant 32 : i32
      %48 = arith.muli %47, %c32_i32 : i32
      %c1_i32_42 = arith.constant 1 : i32
      %49 = arith.addi %arg11, %c1_i32_42 : i32
      %c2_i32_43 = arith.constant 2 : i32
      %50 = arith.cmpi slt, %49, %c2_i32_43 : i32
      %51 = arith.extui %50 : i1 to i32
      %c0_i32_44 = arith.constant 0 : i32
      %52 = arith.cmpi ne, %51, %c0_i32_44 : i32
      scf.if %52 {
        %c1_i32_63 = arith.constant 1 : i32
        %145 = arith.addi %arg11, %c1_i32_63 : i32
        %c1_i32_64 = arith.constant 1 : i32
        %146 = arith.subi %c1_i32_64, %47 : i32
        %c32_i32_65 = arith.constant 32 : i32
        %147 = arith.muli %146, %c32_i32_65 : i32
        %c32_i32_66 = arith.constant 32 : i32
        %148 = arith.muli %145, %c32_i32_66 : i32
        %149 = tpu.assume_multiple %148, 8 : i32
        %150 = arith.index_cast %149 : i32 to index
        %c0_67 = arith.constant 0 : index
        %151 = vector.load %arg10[%150, %c0_67] : memref<64x32xf32, #tpu.memory_space<vmem>>, vector<32x32xf32>
        %c0_68 = arith.constant 0 : index
        %c0_69 = arith.constant 0 : index
        %c0_70 = arith.constant 0 : index
        %152 = vector.load %arg3[%c0_68, %c0_69, %c0_70] : memref<1x32x128xf32, #tpu.memory_space<vmem>>, vector<1x32x128xf32>
        %153 = vector.shape_cast %152 : vector<1x32x128xf32> to vector<32x128xf32>
        %cst_71 = arith.constant dense<0.000000e+00> : vector<32x128xf32>
        %154 = tpu.matmul %151, %153, %cst_71 {dimension_numbers = #tpu.dot_dimension_numbers<[1], [0], [0], [1], [0, 0, 1, 1], [], []>} : vector<32x32xf32>, vector<32x128xf32>, vector<32x128xf32> -> vector<32x128xf32>
        %c1_72 = arith.constant 1 : index
        %c0_73 = arith.constant 0 : index
        %c0_74 = arith.constant 0 : index
        %155 = vector.load %arg5[%c1_72, %c0_73, %c0_74] : memref<2x1x128xf32, #tpu.memory_space<vmem>>, vector<1x1x128xf32>
        %156 = vector.shape_cast %155 : vector<1x1x128xf32> to vector<1x128xf32>
        %157 = vector.broadcast %156 : vector<1x128xf32> to vector<32x128xf32>
        %158 = arith.addf %154, %157 : vector<32x128xf32>
        %159 = tpu.assume_multiple %147, 8 : i32
        %160 = arith.index_cast %159 : i32 to index
        %c0_75 = arith.constant 0 : index
        %161 = vector.load %arg9[%160, %c0_75] : memref<64x128xf32, #tpu.memory_space<vmem>>, vector<32x128xf32>
        tpu.vector_store %arg9[%160, %c0_75], %158 {strides = array<i32>} : memref<64x128xf32, #tpu.memory_space<vmem>>, vector<32x128xf32>,
      } else {
      }
      %c0_i32_45 = arith.constant 0 : i32
      %c8_i32 = arith.constant 8 : i32
      %53 = arith.muli %c0_i32_45, %c8_i32 : i32
      %54 = arith.addi %48, %53 : i32
      %55 = tpu.assume_multiple %54, 8 : i32
      %56 = arith.index_cast %55 : i32 to index
      %c0_46 = arith.constant 0 : index
      %57 = vector.load %arg9[%56, %c0_46] : memref<64x128xf32, #tpu.memory_space<vmem>>, vector<8x128xf32>
      %cst_47 = arith.constant dense<0.000000e+00> : vector<8x128xf32>
      %58 = tpu.matmul %arg12, %23, %cst_47 {dimension_numbers = #tpu.dot_dimension_numbers<[1], [0], [0], [1], [0, 0, 1, 1], [], []>} : vector<8x32xf32>, vector<32x128xf32>, vector<8x128xf32> -> vector<8x128xf32>
      %59 = arith.addf %57, %58 : vector<8x128xf32>
      %60 = math.tanh %59 : vector<8x128xf32>
      %61 = arith.negf %59 : vector<8x128xf32>
      %62 = math.exp %61 : vector<8x128xf32>
      %cst_48 = arith.constant 1.000000e+00 : f32
      %63 = vector.broadcast %cst_48 : f32 to vector<8x128xf32>
      %64 = arith.addf %63, %62 : vector<8x128xf32>
      %65 = arith.divf %63, %64 : vector<8x128xf32>
      %66 = arith.select %2, %60, %65 : vector<8x128xi1>, vector<8x128xf32>
      %67 = vector.extract_strided_slice %66 {offsets = [0, 0], sizes = [8, 32], strides = [1, 1]} : vector<8x128xf32> to vector<8x32xf32>
      %68 = vector.extract_strided_slice %66 {offsets = [0, 32], sizes = [8, 32], strides = [1, 1]} : vector<8x128xf32> to vector<8x32xf32>
      %69 = vector.extract_strided_slice %66 {offsets = [0, 64], sizes = [8, 32], strides = [1, 1]} : vector<8x128xf32> to vector<8x32xf32>
      %70 = vector.extract_strided_slice %66 {offsets = [0, 96], sizes = [8, 32], strides = [1, 1]} : vector<8x128xf32> to vector<8x32xf32>
      %71 = arith.mulf %68, %arg13 : vector<8x32xf32>
      %72 = arith.mulf %67, %70 : vector<8x32xf32>
      %73 = arith.addf %71, %72 : vector<8x32xf32>
      %74 = math.tanh %73 : vector<8x32xf32>
      %75 = arith.mulf %69, %74 : vector<8x32xf32>
      %c1_i32_49 = arith.constant 1 : i32
      %c8_i32_50 = arith.constant 8 : i32
      %76 = arith.muli %c1_i32_49, %c8_i32_50 : i32
      %77 = arith.addi %48, %76 : i32
      %78 = tpu.assume_multiple %77, 8 : i32
      %79 = arith.index_cast %78 : i32 to index
      %c0_51 = arith.constant 0 : index
      %80 = vector.load %arg9[%79, %c0_51] : memref<64x128xf32, #tpu.memory_space<vmem>>, vector<8x128xf32>
      %cst_52 = arith.constant dense<0.000000e+00> : vector<8x128xf32>
      %81 = tpu.matmul %75, %23, %cst_52 {dimension_numbers = #tpu.dot_dimension_numbers<[1], [0], [0], [1], [0, 0, 1, 1], [], []>} : vector<8x32xf32>, vector<32x128xf32>, vector<8x128xf32> -> vector<8x128xf32>
      %82 = arith.addf %80, %81 : vector<8x128xf32>
      %83 = math.tanh %82 : vector<8x128xf32>
      %84 = arith.negf %82 : vector<8x128xf32>
      %85 = math.exp %84 : vector<8x128xf32>
      %cst_53 = arith.constant 1.000000e+00 : f32
      %86 = vector.broadcast %cst_53 : f32 to vector<8x128xf32>
      %87 = arith.addf %86, %85 : vector<8x128xf32>
      %88 = arith.divf %86, %87 : vector<8x128xf32>
      %89 = arith.select %2, %83, %88 : vector<8x128xi1>, vector<8x128xf32>
      %90 = vector.extract_strided_slice %89 {offsets = [0, 0], sizes = [8, 32], strides = [1, 1]} : vector<8x128xf32> to vector<8x32xf32>
      %91 = vector.extract_strided_slice %89 {offsets = [0, 32], sizes = [8, 32], strides = [1, 1]} : vector<8x128xf32> to vector<8x32xf32>
      %92 = vector.extract_strided_slice %89 {offsets = [0, 64], sizes = [8, 32], strides = [1, 1]} : vector<8x128xf32> to vector<8x32xf32>
      %93 = vector.extract_strided_slice %89 {offsets = [0, 96], sizes = [8, 32], strides = [1, 1]} : vector<8x128xf32> to vector<8x32xf32>
      %94 = arith.mulf %91, %73 : vector<8x32xf32>
      %95 = arith.mulf %90, %93 : vector<8x32xf32>
      %96 = arith.addf %94, %95 : vector<8x32xf32>
      %97 = math.tanh %96 : vector<8x32xf32>
      %98 = arith.mulf %92, %97 : vector<8x32xf32>
      %c2_i32_54 = arith.constant 2 : i32
      %c8_i32_55 = arith.constant 8 : i32
      %99 = arith.muli %c2_i32_54, %c8_i32_55 : i32
      %100 = arith.addi %48, %99 : i32
      %101 = tpu.assume_multiple %100, 8 : i32
      %102 = arith.index_cast %101 : i32 to index
      %c0_56 = arith.constant 0 : index
      %103 = vector.load %arg9[%102, %c0_56] : memref<64x128xf32, #tpu.memory_space<vmem>>, vector<8x128xf32>
      %cst_57 = arith.constant dense<0.000000e+00> : vector<8x128xf32>
      %104 = tpu.matmul %98, %23, %cst_57 {dimension_numbers = #tpu.dot_dimension_numbers<[1], [0], [0], [1], [0, 0, 1, 1], [], []>} : vector<8x32xf32>, vector<32x128xf32>, vector<8x128xf32> -> vector<8x128xf32>
      %105 = arith.addf %103, %104 : vector<8x128xf32>
      %106 = math.tanh %105 : vector<8x128xf32>
      %107 = arith.negf %105 : vector<8x128xf32>
      %108 = math.exp %107 : vector<8x128xf32>
      %cst_58 = arith.constant 1.000000e+00 : f32
      %109 = vector.broadcast %cst_58 : f32 to vector<8x128xf32>
      %110 = arith.addf %109, %108 : vector<8x128xf32>
      %111 = arith.divf %109, %110 : vector<8x128xf32>
      %112 = arith.select %2, %106, %111 : vector<8x128xi1>, vector<8x128xf32>
      %113 = vector.extract_strided_slice %112 {offsets = [0, 0], sizes = [8, 32], strides = [1, 1]} : vector<8x128xf32> to vector<8x32xf32>
      %114 = vector.extract_strided_slice %112 {offsets = [0, 32], sizes = [8, 32], strides = [1, 1]} : vector<8x128xf32> to vector<8x32xf32>
      %115 = vector.extract_strided_slice %112 {offsets = [0, 64], sizes = [8, 32], strides = [1, 1]} : vector<8x128xf32> to vector<8x32xf32>
      %116 = vector.extract_strided_slice %112 {offsets = [0, 96], sizes = [8, 32], strides = [1, 1]} : vector<8x128xf32> to vector<8x32xf32>
      %117 = arith.mulf %114, %96 : vector<8x32xf32>
      %118 = arith.mulf %113, %116 : vector<8x32xf32>
      %119 = arith.addf %117, %118 : vector<8x32xf32>
      %120 = math.tanh %119 : vector<8x32xf32>
      %121 = arith.mulf %115, %120 : vector<8x32xf32>
      %c3_i32 = arith.constant 3 : i32
      %c8_i32_59 = arith.constant 8 : i32
      %122 = arith.muli %c3_i32, %c8_i32_59 : i32
      %123 = arith.addi %48, %122 : i32
      %124 = tpu.assume_multiple %123, 8 : i32
      %125 = arith.index_cast %124 : i32 to index
      %c0_60 = arith.constant 0 : index
      %126 = vector.load %arg9[%125, %c0_60] : memref<64x128xf32, #tpu.memory_space<vmem>>, vector<8x128xf32>
      %cst_61 = arith.constant dense<0.000000e+00> : vector<8x128xf32>
      %127 = tpu.matmul %121, %23, %cst_61 {dimension_numbers = #tpu.dot_dimension_numbers<[1], [0], [0], [1], [0, 0, 1, 1], [], []>} : vector<8x32xf32>, vector<32x128xf32>, vector<8x128xf32> -> vector<8x128xf32>
      %128 = arith.addf %126, %127 : vector<8x128xf32>
      %129 = math.tanh %128 : vector<8x128xf32>
      %130 = arith.negf %128 : vector<8x128xf32>
      %131 = math.exp %130 : vector<8x128xf32>
      %cst_62 = arith.constant 1.000000e+00 : f32
      %132 = vector.broadcast %cst_62 : f32 to vector<8x128xf32>
      %133 = arith.addf %132, %131 : vector<8x128xf32>
      %134 = arith.divf %132, %133 : vector<8x128xf32>
      %135 = arith.select %2, %129, %134 : vector<8x128xi1>, vector<8x128xf32>
      %136 = vector.extract_strided_slice %135 {offsets = [0, 0], sizes = [8, 32], strides = [1, 1]} : vector<8x128xf32> to vector<8x32xf32>
      %137 = vector.extract_strided_slice %135 {offsets = [0, 32], sizes = [8, 32], strides = [1, 1]} : vector<8x128xf32> to vector<8x32xf32>
      %138 = vector.extract_strided_slice %135 {offsets = [0, 64], sizes = [8, 32], strides = [1, 1]} : vector<8x128xf32> to vector<8x32xf32>
      %139 = vector.extract_strided_slice %135 {offsets = [0, 96], sizes = [8, 32], strides = [1, 1]} : vector<8x128xf32> to vector<8x32xf32>
      %140 = arith.mulf %137, %119 : vector<8x32xf32>
      %141 = arith.mulf %136, %139 : vector<8x32xf32>
      %142 = arith.addf %140, %141 : vector<8x32xf32>
      %143 = math.tanh %142 : vector<8x32xf32>
      %144 = arith.mulf %138, %143 : vector<8x32xf32>
      %c4_i32 = arith.constant 4 : i32
      scf.yield %144, %142 : vector<8x32xf32>, vector<8x32xf32>
    }
    %c2_i32_33 = arith.constant 2 : i32
    %c0_34 = arith.constant 0 : index
    %c0_35 = arith.constant 0 : index
    %41 = vector.load %arg6[%c0_34, %c0_35] : memref<32x128xf32, #tpu.memory_space<vmem>>, vector<32x128xf32>
    %cst_36 = arith.constant dense<0.000000e+00> : vector<8x128xf32>
    %42 = tpu.matmul %40#0, %41, %cst_36 {dimension_numbers = #tpu.dot_dimension_numbers<[1], [0], [0], [1], [0, 0, 1, 1], [], []>} : vector<8x32xf32>, vector<32x128xf32>, vector<8x128xf32> -> vector<8x128xf32>
    %c0_37 = arith.constant 0 : index
    %c0_38 = arith.constant 0 : index
    %43 = vector.load %arg7[%c0_37, %c0_38] : memref<1x128xf32, #tpu.memory_space<vmem>>, vector<1x128xf32>
    %44 = vector.broadcast %43 : vector<1x128xf32> to vector<8x128xf32>
    %45 = arith.addf %42, %44 : vector<8x128xf32>
    %c0_39 = arith.constant 0 : index
    %c0_40 = arith.constant 0 : index
    %46 = vector.load %arg8[%c0_39, %c0_40] : memref<8x128xf32, #tpu.memory_space<vmem>>, vector<8x128xf32>
    tpu.vector_store %arg8[%c0_39, %c0_40], %45 {strides = array<i32>} : memref<8x128xf32, #tpu.memory_space<vmem>>, vector<8x128xf32>,
    return
  }
  func.func @transform_0(%arg0: i32) -> (i32, i32, i32) {
    %c0_i32 = arith.constant 0 : i32
    %c0_i32_0 = arith.constant 0 : i32
    %c0_i32_1 = arith.constant 0 : i32
    return %arg0, %c0_i32, %c0_i32_0 : i32, i32, i32
  }
  func.func @transform_1(%arg0: i32) -> (i32, i32) {
    %c0_i32 = arith.constant 0 : i32
    %c0_i32_0 = arith.constant 0 : i32
    %c0_i32_1 = arith.constant 0 : i32
    return %c0_i32, %c0_i32_0 : i32, i32
  }
  func.func @transform_2(%arg0: i32) -> (i32, i32, i32) {
    %c0_i32 = arith.constant 0 : i32
    %c0_i32_0 = arith.constant 0 : i32
    %c0_i32_1 = arith.constant 0 : i32
    %c0_i32_2 = arith.constant 0 : i32
    return %c0_i32, %c0_i32_0, %c0_i32_1 : i32, i32, i32
  }
  func.func @transform_3(%arg0: i32) -> (i32, i32, i32) {
    %c0_i32 = arith.constant 0 : i32
    %c0_i32_0 = arith.constant 0 : i32
    %c0_i32_1 = arith.constant 0 : i32
    %c0_i32_2 = arith.constant 0 : i32
    return %c0_i32, %c0_i32_0, %c0_i32_1 : i32, i32, i32
  }
  func.func @transform_4(%arg0: i32) -> (i32, i32, i32) {
    %c0_i32 = arith.constant 0 : i32
    %c0_i32_0 = arith.constant 0 : i32
    %c0_i32_1 = arith.constant 0 : i32
    %c0_i32_2 = arith.constant 0 : i32
    return %c0_i32, %c0_i32_0, %c0_i32_1 : i32, i32, i32
  }
  func.func @transform_5(%arg0: i32) -> (i32, i32) {
    %c0_i32 = arith.constant 0 : i32
    %c0_i32_0 = arith.constant 0 : i32
    %c0_i32_1 = arith.constant 0 : i32
    return %c0_i32, %c0_i32_0 : i32, i32
  }
  func.func @transform_6(%arg0: i32) -> (i32, i32) {
    %c0_i32 = arith.constant 0 : i32
    %c0_i32_0 = arith.constant 0 : i32
    %c0_i32_1 = arith.constant 0 : i32
    return %c0_i32, %c0_i32_0 : i32, i32
  }
  func.func @transform_7(%arg0: i32) -> (i32, i32) {
    %c0_i32 = arith.constant 0 : i32
    %c0_i32_0 = arith.constant 0 : i32
    return %arg0, %c0_i32 : i32, i32
  }
}

</mosaic_0001>

<bundles_post_ra>
// kernel: tpu_custom_call.1
= control target key start
LH: loop header
LB: loop body
LE: loop exit
PB: predicated region body
PF: predicated region fallthrough
CT: control target
= control target key end

     0   :  { %12 = vsyncpa [#allocation5], 0  ;;  %s2851_s0 = inlined_call_operand.hbm [shape: f32[1,64,16], index: 0, kind: input, shape index: {}]   ;;  %s2852_s1 = inlined_call_operand.hbm [shape: f32[16,128], index: 1, kind: input, shape index: {}]   ;;  %s2853_s2 = inlined_call_operand.hbm [shape: f32[1,32,128], index: 2, kind: input, shape index: {}]   ;;  %s2854_s3 = inlined_call_operand.hbm [shape: f32[2,32,128], index: 3, kind: input, shape index: {}]   ;;  %s2855_s4 = inlined_call_operand.hbm [shape: f32[2,1,128], index: 4, kind: input, shape index: {}]   ;;  %s2856_s5 = inlined_call_operand.hbm [shape: f32[32,128], index: 5, kind: input, shape index: {}]   ;;  %s2857_s6 = inlined_call_operand.hbm [shape: f32[1,128], index: 6, kind: input, shape index: {}]   ;;  %s2858_s7 = inlined_call_operand.hbm [shape: f32[8,128], index: 7, kind: output, shape index: {}]  }
   0x1   :  { %13 = vsyncpa [#allocation8], 0 }
   0x2   :  { %14 = vsyncpa [#allocation11], 0 }
   0x3   :  { %15 = vsyncpa [#allocation14], 0 }
   0x4   :  { %16 = vsyncpa [#allocation6], 0  ;;  %s2435_s24 = smov [#allocation7]   ;;  %s2436_s26 = smov [#allocation10]  }
   0x5   :  { %s34_s25 = sshll.u32 %s2435_s24, 4  ;;  %s58_s27 = sshll.u32 %s2436_s26, 4  ;;  %s35_s25 = int_to_ptr.vmem [resolvable:$true] %s34_s25  ;;  %s2501_s27 = int_to_ptr.vmem [resolvable:$true] %s58_s27 }
   0x6   :  { %s2201_s30 = scalar_lea.hbm %s2852_s1, 256 }
   0x7   :  { %p2202_p0 = scmp.ne.s32.totalorder %s2852_s1, %s2201_s30  ;;  %p2205_p1 = scmp.lt.u32.totalorder %s2201_s30, %s2852_s1 }
   0x9   :  { %p2207_p2 = pnand %p2205_p1, %p2202_p0 }
   0xb   :  { %2210 = shalt.err (!%p2207_p2)
}
   0xc   :  { %s2211_s12 = scalar_lea.vmem %s35_s25, 256  ;;  %p2216_p4 = scmp.lt.s32.totalorder %s35_s25, %s35_s25 }
   0xd   :  { %p2212_p3 = scmp.ne.s32.totalorder %s35_s25, %s2211_s12  ;;  %p2217_p5 = scmp.lt.s32.totalorder %s2211_s12, %s2211_s12 }
   0xf   :  { %p2218_p6 = por %p2217_p5, %p2216_p4 }
  0x11   :  { %p2219_p7 = pnand %p2218_p6, %p2212_p3 }
  0x13   :  { %2222 = shalt.err (!%p2219_p7)
}
  0x14   :  { %s2437_s13 = smov 128   ;;  %s2438_s14 = smov 8  }
  0x15   :  { %40 = dma.hbm_to_vmem [thread:$0]  %s2852_s1, 256, %s35_s25, [#allocation8], %s2437_s13, %s2437_s13, %s2438_s14  }
  0x16   :  { %s2223_s19 = scalar_lea.hbm %s2854_s3, 1024 }
  0x17   :  { %p2224_p8 = scmp.ne.s32.totalorder %s2854_s3, %s2223_s19  ;;  %p2227_p9 = scmp.lt.u32.totalorder %s2223_s19, %s2854_s3 }
  0x19   :  { %p2229_p10 = pnand %p2227_p9, %p2224_p8 }
  0x1b   :  { %2232 = shalt.err (!%p2229_p10)
}
  0x1c   :  { %s2233_s24 = scalar_lea.vmem %s2501_s27, 1024  ;;  %p2238_p12 = scmp.lt.s32.totalorder %s2501_s27, %s2501_s27 }
  0x1d   :  { %p2234_p11 = scmp.ne.s32.totalorder %s2501_s27, %s2233_s24  ;;  %p2239_p13 = scmp.lt.s32.totalorder %s2233_s24, %s2233_s24 }
  0x1f   :  { %p2240_p0 = por %p2239_p13, %p2238_p12 }
  0x21   :  { %p2241_p1 = pnand %p2240_p0, %p2234_p11 }
  0x23   :  { %2244 = shalt.err (!%p2241_p1)
}
  0x24   :  { %64 = dma.hbm_to_vmem [thread:$0]  %s2854_s3, 1024, %s2501_s27, [#allocation11], %s2437_s13, %s2437_s13, %s2438_s14  }
  0x25   :  { %s2439_s26 = smov [#allocation13]   ;;  %s2440_s29 = smov [#allocation4]  }
  0x26   :  { %s82_s28 = sshll.u32 %s2439_s26, 4  ;;  %s22_s30 = sshll.u32 %s2440_s29, 4  ;;  %s83_s28 = int_to_ptr.vmem [resolvable:$true] %s82_s28  ;;  %s2538_s30 = int_to_ptr.vmem [resolvable:$true] %s22_s30 }
  0x27   :  { %s2245_s10 = scalar_lea.hbm %s2856_s5, 512 }
  0x28   :  { %p2246_p2 = scmp.ne.s32.totalorder %s2856_s5, %s2245_s10  ;;  %p2249_p3 = scmp.lt.u32.totalorder %s2245_s10, %s2856_s5 }
  0x2a   :  { %p2251_p4 = pnand %p2249_p3, %p2246_p2 }
  0x2c   :  { %2254 = shalt.err (!%p2251_p4)
}
  0x2d   :  { %s2255_s3 = scalar_lea.vmem %s83_s28, 512  ;;  %p2260_p6 = scmp.lt.s32.totalorder %s83_s28, %s83_s28 }
  0x2e   :  { %p2256_p5 = scmp.ne.s32.totalorder %s83_s28, %s2255_s3  ;;  %p2261_p7 = scmp.lt.s32.totalorder %s2255_s3, %s2255_s3 }
  0x30   :  { %p2262_p8 = por %p2261_p7, %p2260_p6 }
  0x32   :  { %p2263_p9 = pnand %p2262_p8, %p2256_p5 }
  0x34   :  { %2266 = shalt.err (!%p2263_p9)
}
  0x35   :  { %88 = dma.hbm_to_vmem [thread:$0]  %s2856_s5, 512, %s83_s28, [#allocation14], %s2437_s13, %s2437_s13, %s2438_s14  }
  0x36   :  { %s2267_s20 = scalar_lea.hbm %s2851_s0, 1024 }
  0x37   :  { %p2268_p10 = scmp.ne.s32.totalorder %s2851_s0, %s2267_s20  ;;  %p2271_p11 = scmp.lt.u32.totalorder %s2267_s20, %s2851_s0 }
  0x39   :  { %p2273_p12 = pnand %p2271_p11, %p2268_p10 }
  0x3b   :  { %2276 = shalt.err (!%p2273_p12)
}
  0x3c   :  { %s2277_s1 = scalar_lea.vmem %s2538_s30, 1024  ;;  %p2282_p0 = scmp.lt.s32.totalorder %s2538_s30, %s2538_s30 }
  0x3d   :  { %p2278_p13 = scmp.ne.s32.totalorder %s2538_s30, %s2277_s1  ;;  %p2283_p1 = scmp.lt.s32.totalorder %s2277_s1, %s2277_s1 }
  0x3f   :  { %p2284_p2 = por %p2283_p1, %p2282_p0 }
  0x41   :  { %p2285_p3 = pnand %p2284_p2, %p2278_p13 }
  0x43   :  { %2288 = shalt.err (!%p2285_p3)
}
  0x44   :  { %28 = dma.hbm_to_vmem [thread:$0]  %s2851_s0, 1024, %s2538_s30, [#allocation5], %s2437_s13, %s2437_s13, %s2438_s14  }
  0x45   :  { %s2441_s26 = smov [#allocation9]   ;;  %s2442_s29 = smov [#allocation12]  }
  0x46   :  { %s46_s28 = sshll.u32 %s2441_s26, 4  ;;  %s70_s8 = sshll.u32 %s2442_s29, 4  ;;  %s47_s28 = int_to_ptr.vmem [resolvable:$true] %s46_s28  ;;  %s2575_s8 = int_to_ptr.vmem [resolvable:$true] %s70_s8 }
  0x47   :  { %s2289_s11 = scalar_lea.hbm %s2853_s2, 512 }
  0x48   :  { %p2290_p4 = scmp.ne.s32.totalorder %s2853_s2, %s2289_s11  ;;  %p2293_p5 = scmp.lt.u32.totalorder %s2289_s11, %s2853_s2 }
  0x4a   :  { %p2295_p6 = pnand %p2293_p5, %p2290_p4 }
  0x4c   :  { %2298 = shalt.err (!%p2295_p6)
}
  0x4d   :  { %s2299_s0 = scalar_lea.vmem %s47_s28, 512  ;;  %p2304_p8 = scmp.lt.s32.totalorder %s47_s28, %s47_s28 }
  0x4e   :  { %p2300_p7 = scmp.ne.s32.totalorder %s47_s28, %s2299_s0  ;;  %p2305_p9 = scmp.lt.s32.totalorder %s2299_s0, %s2299_s0 }
  0x50   :  { %p2306_p10 = por %p2305_p9, %p2304_p8 }
  0x52   :  { %p2307_p11 = pnand %p2306_p10, %p2300_p7 }
  0x54   :  { %2310 = shalt.err (!%p2307_p11)
}
  0x55   :  { %52 = dma.hbm_to_vmem [thread:$0]  %s2853_s2, 512, %s47_s28, [#allocation8], %s2437_s13, %s2437_s13, %s2438_s14  }
  0x56   :  { %s2311_s19 = scalar_lea.hbm %s2855_s4, 32 }
  0x57   :  { %p2312_p12 = scmp.ne.s32.totalorder %s2855_s4, %s2311_s19  ;;  %p2315_p13 = scmp.lt.u32.totalorder %s2311_s19, %s2855_s4 }
  0x59   :  { %p2317_p0 = pnand %p2315_p13, %p2312_p12 }
  0x5b   :  { %2320 = shalt.err (!%p2317_p0)
}
  0x5c   :  { %s2321_s24 = scalar_lea.vmem %s2575_s8, 32  ;;  %p2326_p2 = scmp.lt.s32.totalorder %s2575_s8, %s2575_s8 }
  0x5d   :  { %p2322_p1 = scmp.ne.s32.totalorder %s2575_s8, %s2321_s24  ;;  %p2327_p3 = scmp.lt.s32.totalorder %s2321_s24, %s2321_s24 }
  0x5f   :  { %p2328_p4 = por %p2327_p3, %p2326_p2 }
  0x61   :  { %p2329_p5 = pnand %p2328_p4, %p2322_p1 }
  0x63   :  { %2332 = shalt.err (!%p2329_p5)
}
  0x64   :  { %s2443_s2 = smov 16   ;;  %s2444_s13 = smov 1  }
  0x65   :  { %76 = dma.hbm_to_vmem [thread:$0]  %s2855_s4, 32, %s2575_s8, [#allocation11], %s2443_s2, %s2443_s2, %s2444_s13  }
  0x66   :  { %s2445_s5 = smov [#allocation15]   ;;  %s2333_s29 = scalar_lea.hbm %s2857_s6, 16 }
  0x67   :  { %s95_s25 = sshll.u32 %s2445_s5, 4  ;;  %p2334_p6 = scmp.ne.s32.totalorder %s2857_s6, %s2333_s29  ;;  %s96_s25 = int_to_ptr.vmem [resolvable:$true] %s95_s25 }
  0x68   :  { %p2337_p7 = scmp.lt.u32.totalorder %s2333_s29, %s2857_s6 }
  0x6a   :  { %p2339_p8 = pnand %p2337_p7, %p2334_p6 }
  0x6c   :  { %2342 = shalt.err (!%p2339_p8)
}
  0x6d   :  { %s2343_s15 = scalar_lea.vmem %s96_s25, 16  ;;  %s2347_s4 = scalar_lea.vmem %s96_s25, 32 }
  0x6e   :  { %p2344_p9 = scmp.ne.s32.totalorder %s96_s25, %s2343_s15  ;;  %p2348_p10 = scmp.lt.s32.totalorder %s96_s25, %s96_s25 }
  0x6f   :  { %p2349_p11 = scmp.lt.s32.totalorder %s2347_s4, %s2343_s15 }
  0x71   :  { %p2350_p12 = por %p2349_p11, %p2348_p10 }
  0x73   :  { %p2351_p13 = pnand %p2350_p12, %p2344_p9 }
  0x75   :  { %2354 = shalt.err (!%p2351_p13)
}
  0x76   :  { %98 = dma.hbm_to_vmem [thread:$0]  %s2857_s6, 16, %s96_s25, [#allocation14]  }
  0x77   :  { %2401 = dma.done.wait [#allocation5], 1024  }
  0x78   :  { %2402 = vsyncadd [#allocation5], 4294966272 }
  0x79   :  { %2403 = dma.done.wait [#allocation8], 768  }
  0x7a   :  { %2404 = vsyncadd [#allocation8], 4294966528 }
  0x7b   :  { %2405 = dma.done.wait [#allocation11], 1056  }
  0x7c   :  { %2406 = vsyncadd [#allocation11], 4294966240 }
  0x7d   :  { %2407 = dma.done.wait [#allocation14], 528  }
  0x7e   :  { %2408 = vsyncadd [#allocation14], 4294966768  ;;  %v120_v0 = vlaneseq  ;;  %v2624_v2 = vld [vmem:[#allocation10] sm:$0xff]  ;;  %v2626_v3 = vld [vmem:[#allocation10 + $0x8] sm:$0xff]  ;;  %vm140_vm1 = vcmask 130048   ;;  %v2636_v22 = vmov 0.0  }
  0x7f   :  { %v2628_v4 = vld [vmem:[#allocation10 + $0x10] sm:$0xff]  ;;  %v2630_v5 = vld [vmem:[#allocation10 + $0x18] sm:$0xff]  ;;  %v129_v10 = vld [vmem:[#allocation4 + $0x10] sm:$0xff]  ;;  %v2638_v23 = vmov 0.0   ;;  %s2640_s6 = smov 0  }
  0x80   :  { %v2621_v1 = vand.u32 127, %v120_v0  ;;  %v131_v6 = vld [vmem:[#allocation7] sm:$0xff]  ;;  %v132_v7 = vld [vmem:[#allocation7 + $0x8] sm:$0xff]  ;;  %1833 = vmatprep.mubr.msk.f32.mxu1 %vm140_vm1, %v129_v10  ;;  %v130_v12 = vld [vmem:[#allocation4 + $0x18] sm:$0xff] }
  0x81   :  { %v1973_v8 = vpack.c.bf16 %v132_v7, %v131_v6  ;;  %v127_v9 = vld [vmem:[#allocation4] sm:$0xff]  ;;  %v128_v11 = vld [vmem:[#allocation4 + $0x8] sm:$0xff]  ;;  %v1672_v13 = vld [vmem:[#allocation12] ss:$0 sm:$0xff] }
  0x82   :  { %vm122_vm0 = vcmp.ge.s32.totalorder %v2621_v1, 96  ;;  %1830 = vmatprep.mubr.msk.f32.mxu0 %vm140_vm1, %v127_v9 }
  0x83   :  { %1974 = vmatprep.subr.bf16.mxu0 %v1973_v8  ;;  %2051 = vmatprep.subr.bf16.mxu1 %v1973_v8 }
  0x84   :  { %1976 = vmatpush3.bf16.msra.mxu0 %v1973_v8  ;;  %2052 = vmatpush3.bf16.msra.mxu1 %v1973_v8 }
  0x87   :  { %1831 = vmatmul.mubr.msk.f32.vlgmr.msra.gmra.mrb[0].mxu0 %vm140_vm1, %v128_v11  ;;  %1834 = vmatmul.mubr.msk.f32.vlgmr.msra.gmra.mrb[0].mxu1 %vm140_vm1, %v130_v12 }
 0x15a   :  { %v1832_v14 = vpop.f32.mrb[0].mxu0  ;;  %v1835_v15 = vpop.f32.mrb[0].mxu1 }
 0x15b   :  { %v225_v16 = vadd.f32 %v1832_v14, %v1672_v13  ;;  %v235_v17 = vadd.f32 %v1835_v15, %v1672_v13  ;;  %v219_v18 = vpop.f32.mrb[1].mxu0  ;;  %v229_v19 = vpop.f32.mrb[1].mxu1 }
 0x15c   :  { %v220_v20 = vadd.f32 %v1672_v13, %v219_v18  ;;  %v230_v21 = vadd.f32 %v1672_v13, %v229_v19 }
 0x15d   :  { %239 = vst [vmem:[#allocation2 + $0x8] sm:$0xff] %v225_v16  ;;  %241 = vst [vmem:[#allocation2 + $0x18] sm:$0xff] %v235_v17 }
 0x15e   :  { %238 = vst [vmem:[#allocation2] sm:$0xff] %v220_v20  ;;  %240 = vst [vmem:[#allocation2 + $0x10] sm:$0xff] %v230_v21 }
 0x15f LB: > { %p250_p0 = scmp.lt.s32.totalorder %s2421_s6, 0  ;;  %s251_s3 = ssub.s32 0, %s2421_s6  ;;  %s2421_s6 = sphi %s2640_s6, %s2860_s6   ;;  %v2417_v23 = vphi %v2638_v23, %v811_v23   ;;  %v2413_v22 = vphi %v2636_v22, %v805_v22  }
 0x160   : > { %s1677_s0 = smin.u32 %s2421_s6, %s251_s3  ;;  %s257_s30 = sadd.s32 1, %s2421_s6  }
 0x161   : > { %s253_s27 = sand.u32 1, %s1677_s0   ;;  %p2658_p1 = scmp.ge.s32.totalorder %s257_s30, 2 }
 0x162   : > { %s254_s17 = ssub.s32 0, %s253_s27  ;;  %v270_v24 = vld [vmem:[#allocation7] sm:$0xff] (!%p2658_p1)  ;;  %v271_v25 = vld [vmem:[#allocation7 + $0x8] sm:$0xff] (!%p2658_p1)  ;;  %s1681_s20 = sshll.u32 (!%p2658_p1), %s2421_s6, 5  ;;  %v1686_v31 = vld [vmem:[#allocation12] ss:$0 sm:$0xff] (!%p2658_p1) }
 0x163   : > { %s2865_s17 = smov (!%p250_p0, %s254_s17), %s253_s27  ;;  %261 = sbr.rel (%p2658_p1) target bundleno = 578 (0x242), region = 68 }
 0x164   : > { %s1678_s18 = sshll.u32 %s2865_s17, 5  ;;  %v1977_v26 = vpack.c.bf16 (!%p2658_p1), %v271_v25, %v270_v24  ;;  %s1605_s21 = scalar_lea.vmem (!%p2658_p1), [#allocation4], %s1681_s20 }
 0x165   : > { %v1682_v27 = vld [vmem:[%s1605_s21 + $0x20] sm:$0xff] (!%p2658_p1)  ;;  %v1684_v28 = vld [vmem:[%s1605_s21 + $0x30] sm:$0xff] (!%p2658_p1)  ;;  %v1683_v29 = vld [vmem:[%s1605_s21 + $0x28] sm:$0xff] (!%p2658_p1)  ;;  %s262_s22 = ssub.s32 (!%p2658_p1), 1, %s2865_s17 }
 0x166   : > { %1978 = vmatprep.subr.bf16.mxu0 (!%p2658_p1), %v1977_v26  ;;  %2053 = vmatprep.subr.bf16.mxu1 (!%p2658_p1), %v1977_v26  ;;  %v1685_v30 = vld [vmem:[%s1605_s21 + $0x38] sm:$0xff] (!%p2658_p1)  ;;  %s1680_s23 = sshll.u32 (!%p2658_p1), %s262_s22, 5 }
 0x167   : > { %1980 = vmatpush3.bf16.msra.mxu0 (!%p2658_p1), %v1977_v26  ;;  %2054 = vmatpush3.bf16.msra.mxu1 (!%p2658_p1), %v1977_v26  ;;  %s376_s24 = scalar_lea.vmem (!%p2658_p1), [#allocation2], %s1680_s23 }
 0x168   : > { %1840 = vmatprep.mubr.msk.f32.mxu0 (!%p2658_p1), %vm140_vm1, %v1682_v27  ;;  %1843 = vmatprep.mubr.msk.f32.mxu1 (!%p2658_p1), %vm140_vm1, %v1684_v28 }
 0x16a   : > { %1841 = vmatmul.mubr.msk.f32.vlgmr.msra.gmra.mrb[0].mxu0 %vm140_vm1, %v1683_v29  ;;  %1844 = vmatmul.mubr.msk.f32.vlgmr.msra.gmra.mrb[0].mxu1 %vm140_vm1, %v1685_v30 }
 0x23d   : > { %v1842_v32 = vpop.f32.mrb[0].mxu0  ;;  %v1845_v33 = vpop.f32.mrb[0].mxu1 }
 0x23e   : > { %v363_v34 = vadd.f32 %v1842_v32, %v1686_v31  ;;  %v373_v35 = vadd.f32 %v1845_v33, %v1686_v31  ;;  %v357_v36 = vpop.f32.mrb[1].mxu0  ;;  %v367_v37 = vpop.f32.mrb[1].mxu1 }
 0x23f   : > { %v358_v38 = vadd.f32 %v1686_v31, %v357_v36  ;;  %v368_v39 = vadd.f32 %v1686_v31, %v367_v37 }
 0x240   : > { %378 = vst [vmem:[%s376_s24 + $0x8] sm:$0xff] %v363_v34  ;;  %380 = vst [vmem:[%s376_s24 + $0x18] sm:$0xff] %v373_v35 }
 0x241   : > { %377 = vst [vmem:[%s376_s24] sm:$0xff] %v358_v38  ;;  %379 = vst [vmem:[%s376_s24 + $0x10] sm:$0xff] %v368_v39 }
 0x242 PF: > { %v1982_v40 = vpack.c.bf16 %v2626_v3, %v2624_v2  ;;  %s2446_s2 = smov 64   ;;  %v2447_v41 = vmov 0.0|0.0   ;;  %v1985_v42 = vpack.c.bf16 %v2630_v5, %v2628_v4  ;;  %vm2448_vm2 = vmmov 0   ;;  %s2681_s13 = scalar_lea.vmem [#allocation2], %s1678_s18  ;;  %v1715_v4 = vld [vmem:[#allocation12 + $0x1] ss:$0 sm:$0xff] (%p2658_p1) }
 0x243   : > { %384 = vrot.lane.b32.xlu0 %v2417_v23, %s2446_s2  ;;  %1981 = vmatprep.subr.bf16.mxu0 %v2447_v41  ;;  %v2449_v43 = vmov 0.0   ;;  %vm386_vm3 = vcmask 261120   ;;  %s2450_s14 = smov 32   ;;  %s1693_s1 = sshll.u32 %s2421_s6, 5 }
 0x244   : > { %1983 = vmatpush3.bf16.msra.mxu0 %v1982_v40  ;;  %1854 = vmatprep.mubr.msk.f32.mxu0 %vm2448_vm2, %v2449_v43  ;;  %s2692_s5 = scalar_lea.vmem [#allocation3], %s1693_s1  ;;  %s2860_s6 = smov %s257_s30 }
 0x245   : > { %1984 = vmatprep.subr.bf16.mxu0 %v2447_v41  ;;  %1987 = vmatprep.subr.bf16.mxu1 %v2447_v41  ;;  %s2753_s25 = smov (%p2658_p1), 0  }
 0x246   : > { %1989 = vmatpush3.bf16.msra.mxu1 %v1982_v40  ;;  %1865 = vmatprep.mubr.msk.f32.mxu1 %vm2448_vm2, %v2449_v43 }
 0x247   : > { %1990 = vmatprep.subr.bf16.mxu1 %v2447_v41 }
 0x248   : > { %1986 = vmatpush3.bf16.msra.mxu0 %v1985_v42  ;;  %v382_v45 = vld [vmem:[%s2681_s13] sm:$0xff]  ;;  %v1695_v0 = vld [vmem:[%s2681_s13 + $0x8] sm:$0xff]  ;;  %v1702_v24 = vld [vmem:[%s2681_s13 + $0x10] sm:$0xff] }
 0x249   : > { %1993 = vmatprep.subr.bf16.mxu0 %v2447_v41 }
 0x24a   : > { %1992 = vmatpush3.bf16.msra.mxu1 %v1985_v42 }
 0x24b   : > { %1999 = vmatprep.subr.bf16.mxu1 %v2447_v41 }
 0x2b5   : > { %v385_v44 = vpop.permute.xlu0 %384 }
 0x2b6   : > { %1855 = vmatmul.mubr.msk.f32.vlgmr.msra.gmra.mrb[0].mxu0 %vm386_vm3, %v385_v44 }
 0x2b7   : > { %1995 = vmatpush3.bf16.msra.mxu0 %v1982_v40  ;;  %1876 = vmatprep.mubr.msk.f32.mxu0 %vm2448_vm2, %v2449_v43 }
 0x2b8   : > { %1996 = vmatprep.subr.bf16.mxu0 %v2447_v41 }
 0x2bb   : > { %1998 = vmatpush3.bf16.msra.mxu0 %v1985_v42 }
 0x389   : > { %v455_v46 = vpop.f32.mrb[0].mxu0 }
 0x38a   : > { %v459_v47 = vadd.f32 %v455_v46, %v382_v45  ;;  %v1856_v48 = vpop.f32.mrb[1].mxu0 }
 0x38c   : > { %v1692_v49 = vmul.f32 -1.442695, %v459_v47 }
 0x38e   : > { %2137 = vpow2.f32 %v1692_v49 }
 0x38f   : > { %2139 = vtanh.f32 %v459_v47 }
 0x398   : > { %v2138_v50 = vpop.eup %2137 }
 0x399   : > { %v464_v51 = vadd.f32 1.0, %v2138_v50  ;;  %v2140_v52 = vpop.eup %2139 }
 0x39b   : > { %2141 = vrcp.f32 %v464_v51 }
 0x3a5   : > { %v2142_v53 = vpop.eup %2141 }
 0x3a6   : > { %v467_v54 = vsel %vm122_vm0, %v2140_v52, %v2142_v53 }
 0x3a7   : > { %470 = vrot.lane.b32.xlu0 %v467_v54, %s2450_s14  ;;  %v468_v57 = vmul.f32 %v2413_v22, %v467_v54 }
 0x419   : > { %v471_v55 = vpop.permute.xlu0 %470 }
 0x41a   : > { %v473_v56 = vmul.f32 %v471_v55, %v467_v54 }
 0x41c   : > { %475 = vrot.lane.b32.xlu1 %v473_v56, %s2450_s14 }
 0x48e   : > { %v476_v58 = vpop.permute.xlu1 %475 }
 0x48f   : > { %v478_v59 = vadd.f32 %v476_v58, %v468_v57 }
 0x491   : > { %2143 = vtanh.f32 %v478_v59 }
 0x49b   : > { %v2144_v60 = vpop.eup %2143 }
 0x49c   : > { %481 = vrot.lane.b32.xlu1 %v2144_v60, %s2450_s14  ;;  %v2737_v60 = vld [vmem:[#allocation10 + $0x20] sm:$0xff] (%p2658_p1) }
 0x50e   : > { %v482_v61 = vpop.permute.xlu1 %481 }
 0x50f   : > { %v484_v62 = vmul.f32 %v482_v61, %v467_v54  ;;  %v2739_v61 = vld [vmem:[#allocation10 + $0x28] sm:$0xff] (%p2658_p1) }
 0x511   : > { %487 = vrot.lane.b32.xlu0 %v484_v62, %s2446_s2  ;;  %v2741_v62 = vld [vmem:[#allocation10 + $0x30] sm:$0xff] (%p2658_p1) }
 0x583   : > { %v488_v63 = vpop.permute.xlu0 %487 }
 0x584   : > { %491 = vst.msk [vmem:[%s2692_s5] sm:$0xff] %vm386_vm3, %v488_v63  ;;  %1866 = vmatmul.mubr.msk.f32.vlgmr.msra.gmra.mrb[0].mxu1 %vm386_vm3, %v488_v63  ;;  %v2743_v63 = vld [vmem:[#allocation10 + $0x38] sm:$0xff] (%p2658_p1) }
 0x585   : > { %2001 = vmatpush3.bf16.msra.mxu1 %v1982_v40  ;;  %1887 = vmatprep.mubr.msk.f32.mxu1 %vm2448_vm2, %v2449_v43  ;;  %v1709_v43 = vld [vmem:[%s2681_s13 + $0x18] sm:$0xff] }
 0x586   : > { %2002 = vmatprep.subr.bf16.mxu1 %v2447_v41 }
 0x589   : > { %2004 = vmatpush3.bf16.msra.mxu1 %v1985_v42 }
 0x657   : > { %v563_v6 = vpop.f32.mrb[0].mxu1 }
 0x658   : > { %v567_v7 = vadd.f32 %v1695_v0, %v563_v6  ;;  %v1867_v8 = vpop.f32.mrb[1].mxu1  ;;  %v829_v0 = vld [vmem:[#allocation9] sm:$0xff] (%p2658_p1)  ;;  %v830_v6 = vld [vmem:[#allocation9 + $0x8] sm:$0xff] (%p2658_p1) }
 0x659   :  { %v831_v8 = vld [vmem:[#allocation9 + $0x10] sm:$0xff] (%p2658_p1) }
 0x65a   : > { %v1697_v9 = vmul.f32 -1.442695, %v567_v7 }
 0x65c   : > { %2145 = vpow2.f32 %v1697_v9  ;;  %v832_v9 = vld [vmem:[#allocation9 + $0x18] sm:$0xff] (%p2658_p1) }
 0x65d   : > { %2147 = vtanh.f32 %v567_v7  ;;  %v2005_v7 = vpack.c.bf16 (%p2658_p1), %v830_v6, %v829_v0 }
 0x65f   :  { %2006 = vmatprep.subr.bf16.mxu0 (%p2658_p1), %v2005_v7  ;;  %2055 = vmatprep.subr.bf16.mxu1 (%p2658_p1), %v2005_v7 }
 0x666   : > { %v2146_v10 = vpop.eup %2145 }
 0x667   : > { %v572_v11 = vadd.f32 1.0, %v2146_v10  ;;  %v2148_v12 = vpop.eup %2147 }
 0x669   : > { %2149 = vrcp.f32 %v572_v11  ;;  %v2009_v11 = vpack.c.bf16 (%p2658_p1), %v832_v9, %v831_v8 }
 0x673   : > { %v2150_v13 = vpop.eup %2149 }
 0x674   : > { %v575_v14 = vsel %vm122_vm0, %v2148_v12, %v2150_v13 }
 0x675   : > { %578 = vrot.lane.b32.xlu1 %v575_v14, %s2450_s14  ;;  %v576_v17 = vmul.f32 %v575_v14, %v478_v59 }
 0x6e7   : > { %v579_v15 = vpop.permute.xlu1 %578 }
 0x6e8   : > { %v581_v16 = vmul.f32 %v579_v15, %v575_v14 }
 0x6ea   : > { %583 = vrot.lane.b32.xlu0 %v581_v16, %s2450_s14 }
 0x75c   : > { %v584_v18 = vpop.permute.xlu0 %583 }
 0x75d   : > { %v586_v19 = vadd.f32 %v584_v18, %v576_v17 }
 0x75f   : > { %2151 = vtanh.f32 %v586_v19 }
 0x769   : > { %v2152_v20 = vpop.eup %2151 }
 0x76a   : > { %589 = vrot.lane.b32.xlu1 %v2152_v20, %s2450_s14  ;;  %v2749_v20 = vmov (%p2658_p1), 0.0  }
 0x7dc   : > { %v590_v21 = vpop.permute.xlu1 %589 }
 0x7dd   : > { %v592_v22 = vmul.f32 %v590_v21, %v575_v14  ;;  %v2751_v21 = vmov (%p2658_p1), 0.0  }
 0x7df   : > { %597 = vrot.lane.b32.xlu0 %v592_v22, %s2446_s2 }
 0x851   : > { %v598_v23 = vpop.permute.xlu0 %597 }
 0x852   : > { %1700 = vst.msk [vmem:[%s2692_s5 + $0x8] sm:$0xff] %vm386_vm3, %v598_v23  ;;  %1877 = vmatmul.mubr.msk.f32.vlgmr.msra.gmra.mrb[2].mxu0 %vm386_vm3, %v598_v23 }
 0x853   :  { %2008 = vmatpush3.bf16.msra.mxu0 (%p2658_p1), %v2005_v7 }
 0x854   :  { %2010 = vmatprep.subr.bf16.mxu0 (%p2658_p1), %v2009_v11 }
 0x857   :  { %2012 = vmatpush3.bf16.msra.mxu0 (%p2658_p1), %v2009_v11 }
 0x925   : > { %v673_v25 = vpop.f32.mrb[2].mxu0 }
 0x926   : > { %v677_v26 = vadd.f32 %v1702_v24, %v673_v25  ;;  %v1878_v27 = vpop.f32.mrb[3].mxu0 }
 0x928   : > { %v1704_v28 = vmul.f32 -1.442695, %v677_v26 }
 0x92a   : > { %2153 = vpow2.f32 %v1704_v28 }
 0x92b   : > { %2155 = vtanh.f32 %v677_v26 }
 0x934   : > { %v2154_v29 = vpop.eup %2153 }
 0x935   : > { %v682_v30 = vadd.f32 1.0, %v2154_v29  ;;  %v2156_v31 = vpop.eup %2155 }
 0x937   : > { %2157 = vrcp.f32 %v682_v30 }
 0x941   : > { %v2158_v32 = vpop.eup %2157 }
 0x942   : > { %v685_v33 = vsel %vm122_vm0, %v2156_v31, %v2158_v32 }
 0x943   : > { %688 = vrot.lane.b32.xlu1 %v685_v33, %s2450_s14  ;;  %v686_v36 = vmul.f32 %v685_v33, %v586_v19 }
 0x9b5   : > { %v689_v34 = vpop.permute.xlu1 %688 }
 0x9b6   : > { %v691_v35 = vmul.f32 %v689_v34, %v685_v33 }
 0x9b8   : > { %693 = vrot.lane.b32.xlu0 %v691_v35, %s2450_s14 }
 0xa2a   : > { %v694_v37 = vpop.permute.xlu0 %693 }
 0xa2b   : > { %v696_v38 = vadd.f32 %v694_v37, %v686_v36 }
 0xa2d   : > { %2159 = vtanh.f32 %v696_v38 }
 0xa37   : > { %v2160_v39 = vpop.eup %2159 }
 0xa38   : > { %699 = vrot.lane.b32.xlu1 %v2160_v39, %s2450_s14 }
 0xaaa   : > { %v700_v40 = vpop.permute.xlu1 %699 }
 0xaab   : > { %v702_v41 = vmul.f32 %v700_v40, %v685_v33 }
 0xaad   : > { %706 = vrot.lane.b32.xlu0 %v702_v41, %s2446_s2 }
 0xb1f   : > { %v707_v42 = vpop.permute.xlu0 %706 }
 0xb20   : > { %1707 = vst.msk [vmem:[%s2692_s5 + $0x10] sm:$0xff] %vm386_vm3, %v707_v42  ;;  %1888 = vmatmul.mubr.msk.f32.vlgmr.msra.gmra.mrb[2].mxu1 %vm386_vm3, %v707_v42 }
 0xb21   :  { %2057 = vmatpush3.bf16.msra.mxu1 (%p2658_p1), %v2005_v7 }
 0xb22   :  { %2056 = vmatprep.subr.bf16.mxu1 (%p2658_p1), %v2009_v11 }
 0xb25   :  { %2058 = vmatpush3.bf16.msra.mxu1 (%p2658_p1), %v2009_v11 }
 0xbf3   : > { %v782_v44 = vpop.f32.mrb[2].mxu1 }
 0xbf4   : > { %v786_v45 = vadd.f32 %v1709_v43, %v782_v44  ;;  %v1889_v46 = vpop.f32.mrb[3].mxu1 }
 0xbf6   : > { %v1711_v47 = vmul.f32 -1.442695, %v786_v45 }
 0xbf8   : > { %2161 = vpow2.f32 %v1711_v47 }
 0xbf9   : > { %2163 = vtanh.f32 %v786_v45 }
 0xc02   : > { %v2162_v48 = vpop.eup %2161 }
 0xc03   : > { %v791_v49 = vadd.f32 1.0, %v2162_v48  ;;  %v2164_v50 = vpop.eup %2163 }
 0xc05   : > { %2165 = vrcp.f32 %v791_v49 }
 0xc0f   : > { %v2166_v51 = vpop.eup %2165 }
 0xc10   : > { %v794_v52 = vsel %vm122_vm0, %v2164_v50, %v2166_v51 }
 0xc11   : > { %797 = vrot.lane.b32.xlu1 %v794_v52, %s2450_s14  ;;  %v795_v55 = vmul.f32 %v794_v52, %v696_v38 }
 0xc83   : > { %v798_v53 = vpop.permute.xlu1 %797 }
 0xc84   : > { %v800_v54 = vmul.f32 %v798_v53, %v794_v52 }
 0xc86   : > { %802 = vrot.lane.b32.xlu0 %v800_v54, %s2450_s14 }
 0xcf8   : > { %v803_v56 = vpop.permute.xlu0 %802 }
 0xcf9   : > { %v805_v22 = vadd.f32 %v803_v56, %v795_v55  }
 0xcfb   : > { %2167 = vtanh.f32 %v805_v22 }
 0xd05   : > { %v2168_v57 = vpop.eup %2167 }
 0xd06   : > { %808 = vrot.lane.b32.xlu1 %v2168_v57, %s2450_s14 }
 0xd78   : > { %v809_v58 = vpop.permute.xlu1 %808 }
 0xd79   : > { %v811_v23 = vmul.f32 %v809_v58, %v794_v52  }
 0xd7b   : > { %815 = vrot.lane.b32.xlu0 %v811_v23, %s2446_s2 }
 0xde8   :  { %246 = sbr.rel (!%p2658_p1) target bundleno = 351 (0x15f), region = 116 }
 0xded   : > { %v816_v59 = vpop.permute.xlu0 %815 }
 0xdee   : > { %1714 = vst.msk [vmem:[%s2692_s5 + $0x18] sm:$0xff] %vm386_vm3, %v816_v59 }
 0xdf5   :  { %v825_v10 = vld [vmem:[#allocation3] sm:$0xff]  ;;  %v827_v12 = vld [vmem:[#allocation3 + $0x10] sm:$0xff]  ;;  %v826_v2 = vld [vmem:[#allocation3 + $0x8] sm:$0xff] }
 0xdf6   :  { %1898 = vmatprep.mubr.msk.f32.mxu0 %vm386_vm3, %v825_v10  ;;  %1901 = vmatprep.mubr.msk.f32.mxu1 %vm386_vm3, %v827_v12  ;;  %v828_v3 = vld [vmem:[#allocation3 + $0x18] sm:$0xff] }
 0xdf7   :  { %1899 = vmatmul.mubr.msk.f32.vlgmr.msra.gmra.mrb[0].mxu0 %vm386_vm3, %v826_v2  ;;  %1902 = vmatmul.mubr.msk.f32.vlgmr.msra.gmra.mrb[0].mxu1 %vm386_vm3, %v828_v3 }
 0xeca   :  { %v1900_v5 = vpop.f32.mrb[0].mxu0  ;;  %v1903_v13 = vpop.f32.mrb[0].mxu1 }
 0xecb   :  { %v926_v14 = vadd.f32 %v1900_v5, %v1715_v4  ;;  %v936_v15 = vadd.f32 %v1903_v13, %v1715_v4  ;;  %v920_v16 = vpop.f32.mrb[1].mxu0  ;;  %v930_v17 = vpop.f32.mrb[1].mxu1 }
 0xecc   :  { %v921_v18 = vadd.f32 %v1715_v4, %v920_v16  ;;  %v931_v19 = vadd.f32 %v1715_v4, %v930_v17 }
 0xecd   :  { %940 = vst [vmem:[#allocation2 + $0x8] sm:$0xff] %v926_v14  ;;  %942 = vst [vmem:[#allocation2 + $0x18] sm:$0xff] %v936_v15 }
 0xece   :  { %939 = vst [vmem:[#allocation2] sm:$0xff] %v921_v18  ;;  %941 = vst [vmem:[#allocation2 + $0x10] sm:$0xff] %v931_v19 }
 0xecf LB: > { %p951_p2 = scmp.lt.s32.totalorder %s2433_s25, 0  ;;  %s952_s26 = ssub.s32 0, %s2433_s25  ;;  %s2433_s25 = sphi %s2753_s25, %s2863_s25   ;;  %v2429_v21 = vphi %v2751_v21, %v2862_v21   ;;  %v2425_v20 = vphi %v2749_v20, %v1492_v20  }
 0xed0   : > { %s1720_s28 = smin.u32 %s2433_s25, %s952_s26  ;;  %s958_s29 = sadd.s32 1, %s2433_s25  }
 0xed1   : > { %s954_s9 = sand.u32 1, %s1720_s28   ;;  %p2771_p3 = scmp.ge.s32.totalorder %s958_s29, 2 }
 0xed2   : > { %s955_s10 = ssub.s32 0, %s954_s9  ;;  %v971_v22 = vld [vmem:[#allocation9] sm:$0xff] (!%p2771_p3)  ;;  %v972_v23 = vld [vmem:[#allocation9 + $0x8] sm:$0xff] (!%p2771_p3)  ;;  %v973_v24 = vld [vmem:[#allocation9 + $0x10] sm:$0xff] (!%p2771_p3)  ;;  %s1724_s15 = sshll.u32 (!%p2771_p3), %s2433_s25, 5 }
 0xed3   : > { %s2867_s10 = smov (!%p951_p2, %s955_s10), %s954_s9  ;;  %962 = sbr.rel (%p2771_p3) target bundleno = 4022 (0xfb6), region = 79 }
 0xed4   : > { %s1721_s11 = sshll.u32 %s2867_s10, 5  ;;  %v2013_v25 = vpack.c.bf16 (!%p2771_p3), %v972_v23, %v971_v22  ;;  %v974_v26 = vld [vmem:[#allocation9 + $0x18] sm:$0xff] (!%p2771_p3)  ;;  %s1635_s4 = scalar_lea.vmem (!%p2771_p3), [#allocation3], %s1724_s15  ;;  %v1729_v32 = vld [vmem:[#allocation12 + $0x1] ss:$0 sm:$0xff] (!%p2771_p3) }
 0xed5   : > { %v2017_v27 = vpack.c.bf16 (!%p2771_p3), %v974_v26, %v973_v24  ;;  %v1725_v28 = vld [vmem:[%s1635_s4 + $0x20] sm:$0xff] (!%p2771_p3)  ;;  %v1727_v29 = vld [vmem:[%s1635_s4 + $0x30] sm:$0xff] (!%p2771_p3)  ;;  %v1726_v30 = vld [vmem:[%s1635_s4 + $0x28] sm:$0xff] (!%p2771_p3)  ;;  %s963_s8 = ssub.s32 (!%p2771_p3), 1, %s2867_s10 }
 0xed6   : > { %2014 = vmatprep.subr.bf16.mxu0 (!%p2771_p3), %v2013_v25  ;;  %2059 = vmatprep.subr.bf16.mxu1 (!%p2771_p3), %v2013_v25  ;;  %v1728_v31 = vld [vmem:[%s1635_s4 + $0x38] sm:$0xff] (!%p2771_p3)  ;;  %s1723_s16 = sshll.u32 (!%p2771_p3), %s963_s8, 5 }
 0xed7   : > { %2016 = vmatpush3.bf16.msra.mxu0 (!%p2771_p3), %v2013_v25  ;;  %2061 = vmatpush3.bf16.msra.mxu1 (!%p2771_p3), %v2013_v25  ;;  %s1079_s6 = scalar_lea.vmem (!%p2771_p3), [#allocation2], %s1723_s16 }
 0xed8   : > { %2018 = vmatprep.subr.bf16.mxu0 (!%p2771_p3), %v2017_v27  ;;  %2060 = vmatprep.subr.bf16.mxu1 (!%p2771_p3), %v2017_v27 }
 0xed9   : > { %1912 = vmatprep.mubr.msk.f32.mxu0 (!%p2771_p3), %vm386_vm3, %v1725_v28  ;;  %1915 = vmatprep.mubr.msk.f32.mxu1 (!%p2771_p3), %vm386_vm3, %v1727_v29 }
 0xedb   : > { %2020 = vmatpush3.bf16.msra.mxu0 %v2017_v27  ;;  %2062 = vmatpush3.bf16.msra.mxu1 %v2017_v27 }
 0xede   : > { %1913 = vmatmul.mubr.msk.f32.vlgmr.msra.gmra.mrb[0].mxu0 %vm386_vm3, %v1726_v30  ;;  %1916 = vmatmul.mubr.msk.f32.vlgmr.msra.gmra.mrb[0].mxu1 %vm386_vm3, %v1728_v31 }
 0xfb1   : > { %v1914_v33 = vpop.f32.mrb[0].mxu0  ;;  %v1917_v34 = vpop.f32.mrb[0].mxu1 }
 0xfb2   : > { %v1066_v35 = vadd.f32 %v1914_v33, %v1729_v32  ;;  %v1076_v36 = vadd.f32 %v1917_v34, %v1729_v32  ;;  %v1060_v37 = vpop.f32.mrb[1].mxu0  ;;  %v1070_v38 = vpop.f32.mrb[1].mxu1 }
 0xfb3   : > { %v1061_v39 = vadd.f32 %v1729_v32, %v1060_v37  ;;  %v1071_v40 = vadd.f32 %v1729_v32, %v1070_v38 }
 0xfb4   : > { %1081 = vst [vmem:[%s1079_s6 + $0x8] sm:$0xff] %v1066_v35  ;;  %1083 = vst [vmem:[%s1079_s6 + $0x18] sm:$0xff] %v1076_v36 }
 0xfb5   : > { %1080 = vst [vmem:[%s1079_s6] sm:$0xff] %v1061_v39  ;;  %1082 = vst [vmem:[%s1079_s6 + $0x10] sm:$0xff] %v1071_v40 }
 0xfb6 PF: > { %v2022_v41 = vpack.c.bf16 %v2739_v61, %v2737_v60  ;;  %s2451_s3 = smov 64   ;;  %v2452_v42 = vmov 0.0|0.0   ;;  %v2025_v43 = vpack.c.bf16 %v2743_v63, %v2741_v62  ;;  %vm2453_vm4 = vmmov 0   ;;  %s2794_s0 = scalar_lea.vmem [#allocation2], %s1721_s11 }
 0xfb7   : > { %1087 = vrot.lane.b32.xlu0 %v2429_v21, %s2451_s3  ;;  %2021 = vmatprep.subr.bf16.mxu0 %v2452_v42  ;;  %v2454_v44 = vmov 0.0   ;;  %s2455_s30 = smov 32   ;;  %s2863_s25 = smov %s958_s29  ;;  %vm2458_vm5 = vmmov (%p2771_p3), 0  }
 0xfb8   : > { %2023 = vmatpush3.bf16.msra.mxu0 %v2022_v41  ;;  %1926 = vmatprep.mubr.msk.f32.mxu0 %vm2453_vm4, %v2454_v44  ;;  %s2456_s27 = smov (%p2771_p3), 64   ;;  %s2460_s17 = smov (%p2771_p3), [#allocation16]  }
 0xfb9   : > { %2024 = vmatprep.subr.bf16.mxu0 %v2452_v42  ;;  %2027 = vmatprep.subr.bf16.mxu1 %v2452_v42  ;;  %s1592_s18 = sshll.u32 (%p2771_p3), %s2460_s17, 4  ;;  %s1593_s18 = int_to_ptr.vmem [resolvable:$true] %s1592_s18 }
 0xfba   : > { %2029 = vmatpush3.bf16.msra.mxu1 %v2022_v41  ;;  %1937 = vmatprep.mubr.msk.f32.mxu1 %vm2453_vm4, %v2454_v44  ;;  %s2355_s19 = scalar_lea.vmem (%p2771_p3), %s1593_s18, 128  ;;  %p2360_p5 = scmp.lt.s32.totalorder (%p2771_p3), %s1593_s18, %s1593_s18 }
 0xfbb   : > { %2030 = vmatprep.subr.bf16.mxu1 %v2452_v42  ;;  %p2356_p4 = scmp.ne.s32.totalorder (%p2771_p3), %s1593_s18, %s2355_s19  ;;  %p2361_p6 = scmp.lt.s32.totalorder (%p2771_p3), %s2355_s19, %s2355_s19 }
 0xfbc   : > { %2026 = vmatpush3.bf16.msra.mxu0 %v2025_v43  ;;  %v1085_v46 = vld [vmem:[%s2794_s0] sm:$0xff]  ;;  %v1737_v10 = vld [vmem:[%s2794_s0 + $0x8] sm:$0xff]  ;;  %v1741_v25 = vld [vmem:[%s2794_s0 + $0x10] sm:$0xff] }
 0xfbd   : > { %2033 = vmatprep.subr.bf16.mxu0 %v2452_v42  ;;  %p2362_p7 = por (%p2771_p3), %p2361_p6, %p2360_p5 }
 0xfbe   : > { %2032 = vmatpush3.bf16.msra.mxu1 %v2025_v43 }
 0xfbf   : > { %2039 = vmatprep.subr.bf16.mxu1 %v2452_v42  ;;  %p2363_p8 = pnand (%p2771_p3), %p2362_p7, %p2356_p4 }
0x1029   : > { %v1088_v45 = vpop.permute.xlu0 %1087 }
0x102a   : > { %1927 = vmatmul.mubr.msk.f32.vlgmr.msra.gmra.mrb[0].mxu0 %vm386_vm3, %v1088_v45 }
0x102b   : > { %2035 = vmatpush3.bf16.msra.mxu0 %v2022_v41  ;;  %1948 = vmatprep.mubr.msk.f32.mxu0 %vm2453_vm4, %v2454_v44 }
0x102c   : > { %2036 = vmatprep.subr.bf16.mxu0 %v2452_v42 }
0x102f   : > { %2038 = vmatpush3.bf16.msra.mxu0 %v2025_v43 }
0x10fd   : > { %v1157_v47 = vpop.f32.mrb[0].mxu0 }
0x10fe   : > { %v1161_v48 = vadd.f32 %v1157_v47, %v1085_v46  ;;  %v1928_v49 = vpop.f32.mrb[1].mxu0 }
0x1100   : > { %v1735_v50 = vmul.f32 -1.442695, %v1161_v48 }
0x1102   : > { %2169 = vpow2.f32 %v1735_v50 }
0x1103   : > { %2171 = vtanh.f32 %v1161_v48 }
0x110c   : > { %v2170_v51 = vpop.eup %2169 }
0x110d   : > { %v1166_v52 = vadd.f32 1.0, %v2170_v51  ;;  %v2172_v53 = vpop.eup %2171 }
0x110f   : > { %2173 = vrcp.f32 %v1166_v52 }
0x1119   : > { %v2174_v54 = vpop.eup %2173 }
0x111a   : > { %v1169_v55 = vsel %vm122_vm0, %v2172_v53, %v2174_v54 }
0x111b   : > { %1172 = vrot.lane.b32.xlu0 %v1169_v55, %s2455_s30  ;;  %v1170_v58 = vmul.f32 %v2425_v20, %v1169_v55 }
0x118d   : > { %v1173_v56 = vpop.permute.xlu0 %1172 }
0x118e   : > { %v1175_v57 = vmul.f32 %v1173_v56, %v1169_v55 }
0x1190   : > { %1177 = vrot.lane.b32.xlu1 %v1175_v57, %s2455_s30 }
0x1202   : > { %v1178_v59 = vpop.permute.xlu1 %1177 }
0x1203   : > { %v1180_v0 = vadd.f32 %v1178_v59, %v1170_v58 }
0x1205   : > { %2175 = vtanh.f32 %v1180_v0 }
0x120f   : > { %v2176_v6 = vpop.eup %2175 }
0x1210   : > { %1183 = vrot.lane.b32.xlu1 %v2176_v6, %s2455_s30  ;;  %v1499_v6 = vld [vmem:[#allocation13] sm:$0xff] (%p2771_p3) }
0x1282   : > { %v1184_v7 = vpop.permute.xlu1 %1183 }
0x1283   : > { %v1186_v8 = vmul.f32 %v1184_v7, %v1169_v55  ;;  %v1500_v7 = vld [vmem:[#allocation13 + $0x8] sm:$0xff] (%p2771_p3) }
0x1285   : > { %1191 = vrot.lane.b32.xlu0 %v1186_v8, %s2451_s3  ;;  %v1501_v8 = vld [vmem:[#allocation13 + $0x10] sm:$0xff] (%p2771_p3) }
0x12f7   : > { %v1192_v9 = vpop.permute.xlu0 %1191 }
0x12f8   : > { %1938 = vmatmul.mubr.msk.f32.vlgmr.msra.gmra.mrb[0].mxu1 %vm386_vm3, %v1192_v9  ;;  %v2457_v9 = vmov (%p2771_p3), 0.0|0.0  }
0x12f9   : > { %2041 = vmatpush3.bf16.msra.mxu1 %v2022_v41  ;;  %1959 = vmatprep.mubr.msk.f32.mxu1 %vm2453_vm4, %v2454_v44  ;;  %v1745_v44 = vld [vmem:[%s2794_s0 + $0x18] sm:$0xff] }
0x12fa   : > { %2042 = vmatprep.subr.bf16.mxu1 %v2452_v42  ;;  %2045 = vmatprep.subr.bf16.mxu0 (%p2771_p3), %v2457_v9 }
0x12fd   : > { %2044 = vmatpush3.bf16.msra.mxu1 %v2025_v43 }
0x13cb   : > { %v1261_v11 = vpop.f32.mrb[0].mxu1 }
0x13cc   : > { %v1265_v12 = vadd.f32 %v1737_v10, %v1261_v11  ;;  %v1939_v2 = vpop.f32.mrb[1].mxu1  ;;  %v2046_v10 = vpack.c.bf16 (%p2771_p3), %v1500_v7, %v1499_v6  ;;  %v1502_v11 = vld [vmem:[#allocation13 + $0x18] sm:$0xff] (%p2771_p3) }
0x13cd   :  { %v2049_v2 = vpack.c.bf16 (%p2771_p3), %v1502_v11, %v1501_v8 }
0x13ce   : > { %v1739_v3 = vmul.f32 -1.442695, %v1265_v12 }
0x13d0   : > { %2177 = vpow2.f32 %v1739_v3 }
0x13d1   : > { %2179 = vtanh.f32 %v1265_v12  ;;  %v2459_v12 = vmov (%p2771_p3), 0.0  }
0x13da   : > { %v2178_v4 = vpop.eup %2177 }
0x13db   : > { %v1270_v5 = vadd.f32 1.0, %v2178_v4  ;;  %v2180_v13 = vpop.eup %2179  ;;  %v1748_v4 = vld [vmem:[#allocation15] ss:$0 sm:$0xff] (%p2771_p3) }
0x13dd   : > { %2181 = vrcp.f32 %v1270_v5 }
0x13e7   : > { %v2182_v14 = vpop.eup %2181 }
0x13e8   : > { %v1273_v15 = vsel %vm122_vm0, %v2180_v13, %v2182_v14 }
0x13e9   : > { %1276 = vrot.lane.b32.xlu1 %v1273_v15, %s2455_s30  ;;  %v1274_v18 = vmul.f32 %v1273_v15, %v1180_v0 }
0x145b   : > { %v1277_v16 = vpop.permute.xlu1 %1276 }
0x145c   : > { %v1279_v17 = vmul.f32 %v1277_v16, %v1273_v15 }
0x145e   : > { %1281 = vrot.lane.b32.xlu0 %v1279_v17, %s2455_s30 }
0x14d0   : > { %v1282_v19 = vpop.permute.xlu0 %1281 }
0x14d1   : > { %v1284_v20 = vadd.f32 %v1282_v19, %v1274_v18 }
0x14d3   : > { %2183 = vtanh.f32 %v1284_v20 }
0x14dd   : > { %v2184_v21 = vpop.eup %2183 }
0x14de   : > { %1287 = vrot.lane.b32.xlu1 %v2184_v21, %s2455_s30 }
0x1550   : > { %v1288_v22 = vpop.permute.xlu1 %1287 }
0x1551   : > { %v1290_v23 = vmul.f32 %v1288_v22, %v1273_v15 }
0x1553   : > { %1295 = vrot.lane.b32.xlu0 %v1290_v23, %s2451_s3 }
0x15c5   : > { %v1296_v24 = vpop.permute.xlu0 %1295 }
0x15c6   : > { %1949 = vmatmul.mubr.msk.f32.vlgmr.msra.gmra.mrb[2].mxu0 %vm386_vm3, %v1296_v24 }
0x15c7   :  { %1970 = vmatprep.mubr.msk.f32.mxu0 (%p2771_p3), %vm2458_vm5, %v2459_v12  ;;  %2047 = vmatpush3.bf16.msra.mxu0 (%p2771_p3), %v2046_v10 }
0x15c8   :  { %2048 = vmatprep.subr.bf16.mxu0 (%p2771_p3), %v2457_v9 }
0x15cb   :  { %2050 = vmatpush3.bf16.msra.mxu0 (%p2771_p3), %v2049_v2 }
0x1699   : > { %v1365_v26 = vpop.f32.mrb[2].mxu0 }
0x169a   : > { %v1369_v27 = vadd.f32 %v1741_v25, %v1365_v26  ;;  %v1950_v28 = vpop.f32.mrb[3].mxu0 }
0x169c   : > { %v1743_v29 = vmul.f32 -1.442695, %v1369_v27 }
0x169e   : > { %2185 = vpow2.f32 %v1743_v29 }
0x169f   : > { %2187 = vtanh.f32 %v1369_v27 }
0x16a8   : > { %v2186_v30 = vpop.eup %2185 }
0x16a9   : > { %v1374_v31 = vadd.f32 1.0, %v2186_v30  ;;  %v2188_v32 = vpop.eup %2187 }
0x16ab   : > { %2189 = vrcp.f32 %v1374_v31 }
0x16b5   : > { %v2190_v33 = vpop.eup %2189 }
0x16b6   : > { %v1377_v34 = vsel %vm122_vm0, %v2188_v32, %v2190_v33 }
0x16b7   : > { %1380 = vrot.lane.b32.xlu1 %v1377_v34, %s2455_s30  ;;  %v1378_v37 = vmul.f32 %v1377_v34, %v1284_v20 }
0x1729   : > { %v1381_v35 = vpop.permute.xlu1 %1380 }
0x172a   : > { %v1383_v36 = vmul.f32 %v1381_v35, %v1377_v34 }
0x172c   : > { %1385 = vrot.lane.b32.xlu0 %v1383_v36, %s2455_s30 }
0x179e   : > { %v1386_v38 = vpop.permute.xlu0 %1385 }
0x179f   : > { %v1388_v39 = vadd.f32 %v1386_v38, %v1378_v37 }
0x17a1   : > { %2191 = vtanh.f32 %v1388_v39 }
0x17ab   : > { %v2192_v40 = vpop.eup %2191 }
0x17ac   : > { %1391 = vrot.lane.b32.xlu1 %v2192_v40, %s2455_s30 }
0x181e   : > { %v1392_v41 = vpop.permute.xlu1 %1391 }
0x181f   : > { %v1394_v42 = vmul.f32 %v1392_v41, %v1377_v34 }
0x1821   : > { %1399 = vrot.lane.b32.xlu0 %v1394_v42, %s2451_s3 }
0x1893   : > { %v1400_v43 = vpop.permute.xlu0 %1399 }
0x1894   : > { %1960 = vmatmul.mubr.msk.f32.vlgmr.msra.gmra.mrb[2].mxu1 %vm386_vm3, %v1400_v43 }
0x1967   : > { %v1469_v45 = vpop.f32.mrb[2].mxu1 }
0x1968   : > { %v1473_v46 = vadd.f32 %v1745_v44, %v1469_v45  ;;  %v1961_v47 = vpop.f32.mrb[3].mxu1 }
0x196a   : > { %v1747_v48 = vmul.f32 -1.442695, %v1473_v46 }
0x196c   : > { %2193 = vpow2.f32 %v1747_v48 }
0x196d   : > { %2195 = vtanh.f32 %v1473_v46 }
0x1976   : > { %v2194_v49 = vpop.eup %2193 }
0x1977   : > { %v1478_v50 = vadd.f32 1.0, %v2194_v49  ;;  %v2196_v51 = vpop.eup %2195 }
0x1979   : > { %2197 = vrcp.f32 %v1478_v50 }
0x1983   : > { %v2198_v52 = vpop.eup %2197 }
0x1984   : > { %v1481_v53 = vsel %vm122_vm0, %v2196_v51, %v2198_v52 }
0x1985   : > { %1484 = vrot.lane.b32.xlu1 %v1481_v53, %s2455_s30  ;;  %v1482_v56 = vmul.f32 %v1481_v53, %v1388_v39 }
0x19f7   : > { %v1485_v54 = vpop.permute.xlu1 %1484 }
0x19f8   : > { %v1487_v55 = vmul.f32 %v1485_v54, %v1481_v53 }
0x19fa   : > { %1489 = vrot.lane.b32.xlu0 %v1487_v55, %s2455_s30 }
0x1a6c   : > { %v1490_v57 = vpop.permute.xlu0 %1489 }
0x1a6d   : > { %v1492_v20 = vadd.f32 %v1490_v57, %v1482_v56  }
0x1a6f   : > { %2199 = vtanh.f32 %v1492_v20 }
0x1a79   : > { %v2200_v58 = vpop.eup %2199 }
0x1a7a   : > { %1495 = vrot.lane.b32.xlu1 %v2200_v58, %s2455_s30 }
0x1ae9   :  { %947 = sbr.rel (!%p2771_p3) target bundleno = 3791 (0xecf), region = 127 }
0x1aec   : > { %v1496_v59 = vpop.permute.xlu1 %1495 }
0x1aed   : > { %v1498_v0 = vmul.f32 %v1496_v59, %v1481_v53  }
0x1aef   : > { %v2862_v21 = vmov %v1498_v0  ;;  %1511 = vrot.lane.b32.xlu0 (%p2771_p3), %v1498_v0, %s2456_s27 }
0x1b61   :  { %v1512_v3 = vpop.permute.xlu0 %1511 }
0x1b62   :  { %1971 = vmatmul.mubr.msk.f32.vlgmr.msra.gmra.mrb[0].mxu0 %vm386_vm3, %v1512_v3 }
0x1c35   :  { %v1581_v1 = vpop.f32.mrb[0].mxu0 }
0x1c36   :  { %v1582_v60 = vadd.f32 %v1748_v4, %v1581_v1  ;;  %v1972_v61 = vpop.f32.mrb[1].mxu0 }
0x1c38   :  { %1585 = vst [vmem:[#allocation16] sm:$0xff] %v1582_v60 }
0x1c39   :  { %2366 = shalt.err (!%p2363_p8)
}
0x1c3a   :  { %s2367_s22 = scalar_lea.hbm %s2858_s7, 128 }
0x1c3b   :  { %p2368_p9 = scmp.ne.s32.totalorder %s2858_s7, %s2367_s22  ;;  %p2371_p10 = scmp.lt.u32.totalorder %s2367_s22, %s2858_s7 }
0x1c3d   :  { %p2373_p11 = pnand %p2371_p10, %p2368_p9 }
0x1c3f   :  { %2376 = shalt.err (!%p2373_p11)
}
0x1c40   :  { %1595 = dma.vmem_to_hbm [thread:$0]  %s1593_s18, 128, %s2858_s7, [#allocation6]  }
0x1c41   :  { %2409 = dma.done.wait [#allocation6], 128  }
0x1c42   :  { %2410 = vsyncadd [#allocation6], 4294967168 }
0x1c43   :  { %1599 = vsyncpa [#allocation5], 1 }
0x1c44   :  { %1600 = vsyncpa [#allocation8], 1 }
0x1c45   :  { %1601 = vsyncpa [#allocation11], 1 }
0x1c46   :  { %1602 = vsyncpa [#allocation14], 1 }
0x1c47   :  { %1603 = vsyncpa [#allocation6], 1 }

</bundles_post_ra>
